<compile_context>
chip_gen: v7x
topology: tpu7x:2x2x1
jax: 0.10.0
libtpu: 0.0.40
codegen_flags: <defaults>
</compile_context>

<pallas_src>
import jax
import jax.numpy as jnp
from jax.experimental import pallas as pl
from jax.experimental.pallas import tpu as pltpu


def _elu(z):
    # ELU(alpha=1), computed in f32.  The negative branch clamps before exp so no wasted
    # EUP work / overflow on large positive inputs (positive branch is selected anyway).
    return jnp.where(z > 0, z, jnp.exp(jnp.minimum(z, 0.0)) - 1.0)


def _round_up(n, m):
    return ((n + m - 1) // m) * m


# --------------------------------------------------------------------------------------
# Fused kernel: all three biaffine heads in one pallas_call.
# Grid = (batch, query-tile); every grid point produces a (TQ, n_out*T) slab per head.
# --------------------------------------------------------------------------------------
def _make_fused_edge_kernel(meta):
    """meta: tuple of (lane_offset, P, n_out) per head (presence, label, attribute).

    Kernel refs:
      xf_ref : (1, T,  H)  bf16   full batch row (drives `predecessors`)
      xt_ref : (1, TQ, H)  bf16   query tile of the same row (drives `current`)
      wp_ref : (H, Dpad)   bf16   hidden weights -> predecessors (all heads, padded blocks)
      bp_ref : (1, Dpad)   f32    matching bias (constant-1 column encoded as bias=1)
      wc_ref : (H, Dpad)   bf16   hidden weights -> current
      bc_ref : (1, Dpad)   f32
      u*_ref : (P, n_out*P) bf16  augmented bilinear weight per head:
                                  u[d_pred, o*P + d_cur] = U_aug[o][d_cur, d_pred]
                                  (U_aug holds U, W1 in its last used column, W2 in its
                                   last used row, bias in the corner; rest zero-padded)
      out*   : (1, TQ, n_out*T) f32   lane-dense slab, column index = o*T + j
    """

    def kernel(xf_ref, xt_ref, wp_ref, bp_ref, wc_ref, bc_ref,
               u0_ref, u1_ref, u2_ref, out_p_ref, out_l_ref, out_a_ref):
        # Hidden projections: bf16 MXU matmuls with f32 accumulation, bias + ELU in f32,
        # then cast back to bf16 for the bilinear MXU matmuls.
        pred_all = _elu(jnp.dot(xf_ref[0], wp_ref[...],
                                preferred_element_type=jnp.float32)
                        + bp_ref[...]).astype(jnp.bfloat16)            # (T,  Dpad)
        cur_tile = _elu(jnp.dot(xt_ref[0], wc_ref[...],
                                preferred_element_type=jnp.float32)
                        + bc_ref[...]).astype(jnp.bfloat16)            # (TQ, Dpad)

        u_refs = (u0_ref, u1_ref, u2_ref)
        out_refs = (out_p_ref, out_l_ref, out_a_ref)
        for (off, P, n_out), u_ref, out_ref in zip(meta, u_refs, out_refs):
            pred_h = pred_all[:, off:off + P]      # 128-aligned lane slices -> free
            cur_h = cur_tile[:, off:off + P]
            # First bilinear contraction, all output channels at once (K = P >= 128).
            r = jnp.dot(pred_h, u_ref[...],
                        preferred_element_type=jnp.float32)            # (T, n_out*P)
            r = r.astype(jnp.bfloat16)
            # Second contraction per channel (tiny static loop); r slices are 128-aligned.
            # Linear terms + bias are already inside U_aug, so there is no epilogue.
            blocks = [
                jax.lax.dot_general(cur_h, r[:, o * P:(o + 1) * P],
                                    dimension_numbers=(((1,), (1,)), ((), ())),
                                    preferred_element_type=jnp.float32)     # (TQ, T)
                for o in range(n_out)
            ]
            # One wide lane-dense store per head.
            out_ref[0] = blocks[0] if n_out == 1 else jnp.concatenate(blocks, axis=-1)

    return kernel


# --------------------------------------------------------------------------------------
# Parameter construction / fusion (host side).
# --------------------------------------------------------------------------------------
def _init_head_params(key, hidden_dim, bottleneck_dim, output_dim, bias_init):
    """Raw per-head parameters mirroring EdgeBiaffine (Linear + Biaffine)."""
    k1, k2, k3, k4 = jax.random.split(key, 4)
    s = 0.1
    wh_t = jax.random.normal(k1, (hidden_dim, 2 * bottleneck_dim), jnp.float32) * s
    bh = jnp.zeros((2 * bottleneck_dim,), jnp.float32)
    u = jax.random.normal(k2, (output_dim, bottleneck_dim, bottleneck_dim), jnp.float32) * s
    w1 = jax.random.normal(k3, (output_dim, bottleneck_dim), jnp.float32) * s   # acts on `current`
    w2 = jax.random.normal(k4, (output_dim, bottleneck_dim), jnp.float32) * s   # acts on `predecessors`
    bias = jnp.asarray(bias_init, jnp.float32).reshape(output_dim)
    return dict(wh_t=wh_t, bh=bh, u=u, w1=w1, w2=w2, bias=bias)


def _fuse_params(heads):
    """Build padded / augmented weights for the fused kernel.

    Each head h gets a 128-multiple lane block of width P_h = round_up(dh+1, 128):
      cols [0, dh)       : real hidden weights
      col  dh            : zero weight + bias 1.0  -> ELU(1) == 1 (the augmentation const)
      cols [dh+1, P_h)   : zero weight + zero bias -> ELU(0) == 0 (harmless padding)
    U_aug[o] (P_h, P_h):  U in [:dh,:dh], W1 in column dh, W2 in row dh, bias in the corner.
    """
    H = heads[0]["wh_t"].shape[0]
    full_meta = []
    pos = 0
    for hd in heads:
        n_out, dh = hd["w1"].shape
        P = _round_up(dh + 1, 128)
        full_meta.append((pos, P, n_out, dh))
        pos += P
    d_pad = pos

    w_pred = jnp.zeros((H, d_pad), jnp.float32)
    w_cur = jnp.zeros((H, d_pad), jnp.float32)
    b_pred = jnp.zeros((d_pad,), jnp.float32)
    b_cur = jnp.zeros((d_pad,), jnp.float32)
    u_list = []
    for hd, (off, P, n_out, dh) in zip(heads, full_meta):
        # PyTorch chunk order: predecessors = first half, current = second half.
        w_pred = w_pred.at[:, off:off + dh].set(hd["wh_t"][:, :dh])
        w_cur = w_cur.at[:, off:off + dh].set(hd["wh_t"][:, dh:])
        b_pred = b_pred.at[off:off + dh].set(hd["bh"][:dh])
        b_cur = b_cur.at[off:off + dh].set(hd["bh"][dh:])
        # Constant-one feature: weight column is zero, bias 1.0 -> ELU(1) == 1 exactly.
        b_pred = b_pred.at[off + dh].set(1.0)
        b_cur = b_cur.at[off + dh].set(1.0)

        u_aug = jnp.zeros((n_out, P, P), jnp.float32)
        u_aug = u_aug.at[:, :dh, :dh].set(hd["u"])        # cur index c, pred index d
        u_aug = u_aug.at[:, :dh, dh].set(hd["w1"])        # pairs with pred-constant -> W1·cur
        u_aug = u_aug.at[:, dh, :dh].set(hd["w2"])        # pairs with cur-constant  -> W2·pred
        u_aug = u_aug.at[:, dh, dh].set(hd["bias"])       # constant·constant        -> bias
        # Kernel layout: u[d_pred, o*P + d_cur] = U_aug[o][d_cur, d_pred]
        u_h = jnp.transpose(u_aug, (2, 0, 1)).reshape(P, n_out * P)
        u_list.append(u_h.astype(jnp.bfloat16))

    meta = tuple((off, P, n_out) for (off, P, n_out, _dh) in full_meta)
    return dict(
        w_pred=w_pred.astype(jnp.bfloat16), w_cur=w_cur.astype(jnp.bfloat16),
        b_pred=b_pred[None, :], b_cur=b_cur[None, :],            # biases stay f32
        u_list=tuple(u_list), meta=meta)


# --------------------------------------------------------------------------------------
# Forward wrapper.
# --------------------------------------------------------------------------------------
def edge_classifier_forward(x, fused, *, tq=None):
    """x: (B, T, H) -> (presence (B,T,T), label (B,T,T,L), attribute (B,T,T,A))."""
    B, T, H = x.shape
    meta = fused["meta"]
    n_labels = meta[1][2]
    n_attr = meta[2][2]

    if tq is None:
        tq = T if T <= 128 else 128            # query tile (bounds VMEM on v7x, >=2 steps)
    assert T % tq == 0, "sequence length must be a multiple of the query tile"
    nq = T // tq

    x_bf = x.astype(jnp.bfloat16)              # halves x DMA, native bf16 MXU throughput
    kernel = _make_fused_edge_kernel(meta)

    def const_spec(a):
        # Whole weight resident in VMEM, constant across the grid.
        return pl.BlockSpec(a.shape, lambda b, q, _n=a.ndim: (0,) * _n)

    weights = (fused["w_pred"], fused["b_pred"], fused["w_cur"], fused["b_cur"],
               *fused["u_list"])

    out_p, out_l, out_a = pl.pallas_call(
        kernel,
        out_shape=(jax.ShapeDtypeStruct((B, T, T), jnp.float32),
                   jax.ShapeDtypeStruct((B, T, n_labels * T), jnp.float32),
                   jax.ShapeDtypeStruct((B, T, n_attr * T), jnp.float32)),
        grid_spec=pltpu.PrefetchScalarGridSpec(
            num_scalar_prefetch=0,
            grid=(B, nq),
            in_specs=[
                # x is passed twice: full row for `predecessors`, query tile for `current`.
                pl.BlockSpec((1, T, H), lambda b, q: (b, 0, 0)),
                pl.BlockSpec((1, tq, H), lambda b, q: (b, q, 0)),
            ] + [const_spec(w) for w in weights],
            out_specs=(pl.BlockSpec((1, tq, T), lambda b, q: (b, q, 0)),
                       pl.BlockSpec((1, tq, n_labels * T), lambda b, q: (b, q, 0)),
                       pl.BlockSpec((1, tq, n_attr * T), lambda b, q: (b, q, 0))),
        ),
        compiler_params=pltpu.CompilerParams(
            dimension_semantics=("parallel", "parallel"),
            vmem_limit_bytes=32 * 1024 * 1024),
    )(x_bf, x_bf, *weights)

    presence = out_p                                                      # (B, T, T)
    # Slab layout: [b, i, o*T + j].  Converting to PyTorch's (B, T, T, O) needs a transpose
    # of the small (T, O, T) trailer; for a production loss, consume the lane-dense slab
    # directly instead of paying this extra HBM round-trip.
    label = jnp.transpose(out_l.reshape(B, T, n_labels, T), (0, 1, 3, 2))      # (B,T,T,L)
    attribute = jnp.transpose(out_a.reshape(B, T, n_attr, T), (0, 1, 3, 2))    # (B,T,T,A)
    return presence, label, attribute


# --------------------------------------------------------------------------------------
# Pure-JAX references for verification.
# --------------------------------------------------------------------------------------
def _edge_biaffine_reference(x, raw):
    """Un-fused full-f32 reference of one EdgeBiaffine head."""
    hp = jax.lax.Precision.HIGHEST
    h = _elu(jnp.einsum("bth,hd->btd", x, raw["wh_t"], precision=hp) + raw["bh"])
    dh = raw["w1"].shape[1]
    pred, cur = h[..., :dh], h[..., dh:]
    bil = jnp.einsum("bic,ocd,bjd->bijo", cur, raw["u"], pred, precision=hp)
    lin = (jnp.einsum("bic,oc->bio", cur, raw["w1"], precision=hp)[:, :, None, :]
           + jnp.einsum("bjd,od->bjo", pred, raw["w2"], precision=hp)[:, None, :, :]
           + raw["bias"])
    return bil + lin


def _fused_bf16_reference(x, fused):
    """Emulation of the kernel's exact arithmetic (same bf16 casts, f32 accumulation)."""
    hp = jax.lax.Precision.HIGHEST
    f32 = jnp.float32
    B, T, _ = x.shape
    xb = x.astype(jnp.bfloat16).astype(f32)
    pred = _elu(jnp.einsum("bth,hd->btd", xb, fused["w_pred"].astype(f32), precision=hp)
                + fused["b_pred"]).astype(jnp.bfloat16).astype(f32)
    cur = _elu(jnp.einsum("bth,hd->btd", xb, fused["w_cur"].astype(f32), precision=hp)
               + fused["b_cur"]).astype(jnp.bfloat16).astype(f32)
    outs = []
    for (off, P, n_out), u in zip(fused["meta"], fused["u_list"]):
        r = jnp.einsum("btd,dk->btk", pred[..., off:off + P], u.astype(f32), precision=hp)
        r = r.astype(jnp.bfloat16).astype(f32).reshape(B, T, n_out, P)
        e = jnp.einsum("bic,bjoc->bijo", cur[..., off:off + P], r, precision=hp)
        outs.append(e)                                            # (B, T, T, n_out)
    return outs


class EdgeClassifierPallas:
    """Mirrors EdgeClassifier(initialize=True, presence=True, label=True, attribute=True)."""

    def __init__(self, key, *, hidden_size, hidden_size_edge_presence,
                 hidden_size_edge_label, hidden_size_edge_attribute,
                 n_labels, n_attributes,
                 edge_presence_freq, edge_label_freqs, edge_attribute_freq):
        kp, kl, ka = jax.random.split(key, 3)
        p = jnp.array([edge_presence_freq], jnp.float32)
        a = jnp.array([edge_attribute_freq], jnp.float32)
        presence_init = jnp.log(p / (1.0 - p))
        label_init = jnp.log(edge_label_freqs / (1.0 - edge_label_freqs))
        attribute_init = jnp.log(a / (1.0 - a))
        self.raw_heads = (
            _init_head_params(kp, hidden_size, hidden_size_edge_presence, 1, presence_init),
            _init_head_params(kl, hidden_size, hidden_size_edge_label, n_labels, label_init),
            _init_head_params(ka, hidden_size, hidden_size_edge_attribute, n_attributes,
                              attribute_init),
        )
        self.fused = _fuse_params(self.raw_heads)

    def __call__(self, x, loss_weights):
        # scale_grad only rescales gradients -> identity in the forward pass.
        del loss_weights
        return edge_classifier_forward(x, self.fused)


if __name__ == "__main__":
    B, T, H = 2, 8, 32          # batch, sequence length, hidden_size
    DH = 16                     # bottleneck dims
    N_LABELS = 4
    N_ATTRIBUTES = 1            # attribute vocab of size 2 -> single logit

    key = jax.random.PRNGKey(0)
    k_x, k_params = jax.random.split(key)

    model = EdgeClassifierPallas(
        k_params,
        hidden_size=H,
        hidden_size_edge_presence=DH,
        hidden_size_edge_label=DH,
        hidden_size_edge_attribute=DH,
        n_labels=N_LABELS,
        n_attributes=N_ATTRIBUTES,
        edge_presence_freq=0.2,
        edge_label_freqs=jnp.array([0.1, 0.2, 0.3, 0.4], jnp.float32),
        edge_attribute_freq=0.15,
    )

    x = jax.random.normal(k_x, (B, T, H), jnp.float32)
    loss_weights = {"edge presence": 1.0, "edge label": 1.0, "edge attribute": 1.0}

    presence, label, attribute = model(x, loss_weights)
    jax.block_until_ready((presence, label, attribute))

    assert presence.shape == (B, T, T)
    assert label.shape == (B, T, T, N_LABELS)
    assert attribute.shape == (B, T, T, N_ATTRIBUTES)
    assert jnp.all(jnp.isfinite(presence)) and jnp.all(jnp.isfinite(label)) \
        and jnp.all(jnp.isfinite(attribute))

    # Check A (tight): kernel vs. exact emulation of its bf16/f32 arithmetic.
    ref_fused = _fused_bf16_reference(x, model.fused)
    for got, ref in zip((presence[..., None], label, attribute), ref_fused):
        assert jnp.max(jnp.abs(got - ref)) < 2e-3, "kernel deviates from bf16-exact emulation"

    # Check B (loose, absorbs bf16 operand rounding only): kernel vs. un-fused f32 reference.
    ref_p = _edge_biaffine_reference(x, model.raw_heads[0])[..., 0]
    ref_l = _edge_biaffine_reference(x, model.raw_heads[1])
    ref_a = _edge_biaffine_reference(x, model.raw_heads[2])
    for got, ref in ((presence, ref_p), (label, ref_l), (attribute, ref_a)):
        assert jnp.max(jnp.abs(got - ref)) < 5e-2, "fused/augmented weights wrong"

    print("KERNEL_OK")
</pallas_src>

<mosaic_0001>
module attributes {stable_mosaic.version = 11 : i64} {
  func.func @kernel(%arg0: i32, %arg1: i32, %arg2: memref<1x8x32xbf16, #tpu.memory_space<vmem>>, %arg3: memref<1x8x32xbf16, #tpu.memory_space<vmem>>, %arg4: memref<32x384xbf16, #tpu.memory_space<vmem>>, %arg5: memref<1x384xf32, #tpu.memory_space<vmem>>, %arg6: memref<32x384xbf16, #tpu.memory_space<vmem>>, %arg7: memref<1x384xf32, #tpu.memory_space<vmem>>, %arg8: memref<128x128xbf16, #tpu.memory_space<vmem>>, %arg9: memref<128x512xbf16, #tpu.memory_space<vmem>>, %arg10: memref<128x128xbf16, #tpu.memory_space<vmem>>, %arg11: memref<1x8x8xf32, #tpu.memory_space<vmem>>, %arg12: memref<1x8x32xf32, #tpu.memory_space<vmem>>, %arg13: memref<1x8x8xf32, #tpu.memory_space<vmem>>) attributes {dimension_semantics = [#tpu.dimension_semantics<parallel>, #tpu.dimension_semantics<parallel>], iteration_bounds = array<i64: 2, 1>, scalar_prefetch = 0 : i64, scratch_operands = 0 : i64, tpu.core_type = #tpu.core_type<tc>, window_params = [{transform_indices = @transform_0, window_bounds = array<i64: 1, 8, 32>}, {transform_indices = @transform_1, window_bounds = array<i64: 1, 8, 32>}, {pipeline_mode = #tpu.pipeline_mode<synchronous>, transform_indices = @transform_2, window_bounds = array<i64: 32, 384>}, {pipeline_mode = #tpu.pipeline_mode<synchronous>, transform_indices = @transform_3, window_bounds = array<i64: 1, 384>}, {pipeline_mode = #tpu.pipeline_mode<synchronous>, transform_indices = @transform_4, window_bounds = array<i64: 32, 384>}, {pipeline_mode = #tpu.pipeline_mode<synchronous>, transform_indices = @transform_5, window_bounds = array<i64: 1, 384>}, {pipeline_mode = #tpu.pipeline_mode<synchronous>, transform_indices = @transform_6, window_bounds = array<i64: 128, 128>}, {pipeline_mode = #tpu.pipeline_mode<synchronous>, transform_indices = @transform_7, window_bounds = array<i64: 128, 512>}, {pipeline_mode = #tpu.pipeline_mode<synchronous>, transform_indices = @transform_8, window_bounds = array<i64: 128, 128>}, {transform_indices = @transform_9, window_bounds = array<i64: 1, 8, 8>}, {transform_indices = @transform_10, window_bounds = array<i64: 1, 8, 32>}, {transform_indices = @transform_11, window_bounds = array<i64: 1, 8, 8>}]} {
    %c0 = arith.constant 0 : index
    %c0_0 = arith.constant 0 : index
    %c0_1 = arith.constant 0 : index
    %0 = vector.load %arg2[%c0, %c0_0, %c0_1] : memref<1x8x32xbf16, #tpu.memory_space<vmem>>, vector<1x8x32xbf16>
    %1 = vector.shape_cast %0 : vector<1x8x32xbf16> to vector<8x32xbf16>
    %c0_2 = arith.constant 0 : index
    %c0_3 = arith.constant 0 : index
    %2 = vector.load %arg4[%c0_2, %c0_3] : memref<32x384xbf16, #tpu.memory_space<vmem>>, vector<32x384xbf16>
    %cst = arith.constant dense<0.000000e+00> : vector<8x384xf32>
    %3 = tpu.matmul %1, %2, %cst {dimension_numbers = #tpu.dot_dimension_numbers<[1], [0], [0], [1], [0, 0, 1, 1], [], []>} : vector<8x32xbf16>, vector<32x384xbf16>, vector<8x384xf32> -> vector<8x384xf32>
    %c0_4 = arith.constant 0 : index
    %c0_5 = arith.constant 0 : index
    %4 = vector.load %arg5[%c0_4, %c0_5] : memref<1x384xf32, #tpu.memory_space<vmem>>, vector<1x384xf32>
    %5 = vector.broadcast %4 : vector<1x384xf32> to vector<8x384xf32>
    %6 = arith.addf %3, %5 : vector<8x384xf32>
    %cst_6 = arith.constant 0.000000e+00 : f32
    %7 = vector.broadcast %cst_6 : f32 to vector<8x384xf32>
    %8 = arith.cmpf ogt, %6, %7 : vector<8x384xf32>
    %cst_7 = arith.constant 0.000000e+00 : f32
    %9 = vector.broadcast %cst_7 : f32 to vector<8x384xf32>
    %10 = arith.minimumf %6, %9 : vector<8x384xf32>
    %11 = math.exp %10 : vector<8x384xf32>
    %cst_8 = arith.constant 1.000000e+00 : f32
    %12 = vector.broadcast %cst_8 : f32 to vector<8x384xf32>
    %13 = arith.subf %11, %12 : vector<8x384xf32>
    %14 = arith.select %8, %6, %13 : vector<8x384xi1>, vector<8x384xf32>
    %15 = arith.truncf %14 : vector<8x384xf32> to vector<8x384xbf16>
    %c0_9 = arith.constant 0 : index
    %c0_10 = arith.constant 0 : index
    %c0_11 = arith.constant 0 : index
    %16 = vector.load %arg3[%c0_9, %c0_10, %c0_11] : memref<1x8x32xbf16, #tpu.memory_space<vmem>>, vector<1x8x32xbf16>
    %17 = vector.shape_cast %16 : vector<1x8x32xbf16> to vector<8x32xbf16>
    %c0_12 = arith.constant 0 : index
    %c0_13 = arith.constant 0 : index
    %18 = vector.load %arg6[%c0_12, %c0_13] : memref<32x384xbf16, #tpu.memory_space<vmem>>, vector<32x384xbf16>
    %cst_14 = arith.constant dense<0.000000e+00> : vector<8x384xf32>
    %19 = tpu.matmul %17, %18, %cst_14 {dimension_numbers = #tpu.dot_dimension_numbers<[1], [0], [0], [1], [0, 0, 1, 1], [], []>} : vector<8x32xbf16>, vector<32x384xbf16>, vector<8x384xf32> -> vector<8x384xf32>
    %c0_15 = arith.constant 0 : index
    %c0_16 = arith.constant 0 : index
    %20 = vector.load %arg7[%c0_15, %c0_16] : memref<1x384xf32, #tpu.memory_space<vmem>>, vector<1x384xf32>
    %21 = vector.broadcast %20 : vector<1x384xf32> to vector<8x384xf32>
    %22 = arith.addf %19, %21 : vector<8x384xf32>
    %cst_17 = arith.constant 0.000000e+00 : f32
    %23 = vector.broadcast %cst_17 : f32 to vector<8x384xf32>
    %24 = arith.cmpf ogt, %22, %23 : vector<8x384xf32>
    %cst_18 = arith.constant 0.000000e+00 : f32
    %25 = vector.broadcast %cst_18 : f32 to vector<8x384xf32>
    %26 = arith.minimumf %22, %25 : vector<8x384xf32>
    %27 = math.exp %26 : vector<8x384xf32>
    %cst_19 = arith.constant 1.000000e+00 : f32
    %28 = vector.broadcast %cst_19 : f32 to vector<8x384xf32>
    %29 = arith.subf %27, %28 : vector<8x384xf32>
    %30 = arith.select %24, %22, %29 : vector<8x384xi1>, vector<8x384xf32>
    %31 = arith.truncf %30 : vector<8x384xf32> to vector<8x384xbf16>
    %32 = vector.extract_strided_slice %15 {offsets = [0, 0], sizes = [8, 128], strides = [1, 1]} : vector<8x384xbf16> to vector<8x128xbf16>
    %33 = vector.extract_strided_slice %31 {offsets = [0, 0], sizes = [8, 128], strides = [1, 1]} : vector<8x384xbf16> to vector<8x128xbf16>
    %c0_20 = arith.constant 0 : index
    %c0_21 = arith.constant 0 : index
    %34 = vector.load %arg8[%c0_20, %c0_21] : memref<128x128xbf16, #tpu.memory_space<vmem>>, vector<128x128xbf16>
    %cst_22 = arith.constant dense<0.000000e+00> : vector<8x128xf32>
    %35 = tpu.matmul %32, %34, %cst_22 {dimension_numbers = #tpu.dot_dimension_numbers<[1], [0], [0], [1], [0, 0, 1, 1], [], []>} : vector<8x128xbf16>, vector<128x128xbf16>, vector<8x128xf32> -> vector<8x128xf32>
    %36 = arith.truncf %35 : vector<8x128xf32> to vector<8x128xbf16>
    %cst_23 = arith.constant dense<0.000000e+00> : vector<8x8xf32>
    %37 = tpu.matmul %33, %36, %cst_23 {dimension_numbers = #tpu.dot_dimension_numbers<[1], [1], [0], [0], [0, 0, 1, 0], [], []>} : vector<8x128xbf16>, vector<8x128xbf16>, vector<8x8xf32> -> vector<8x8xf32>
    %c0_24 = arith.constant 0 : index
    %c0_25 = arith.constant 0 : index
    %c0_26 = arith.constant 0 : index
    %38 = vector.load %arg11[%c0_24, %c0_25, %c0_26] : memref<1x8x8xf32, #tpu.memory_space<vmem>>, vector<1x8x8xf32>
    %39 = vector.shape_cast %38 : vector<1x8x8xf32> to vector<8x8xf32>
    %40 = vector.shape_cast %37 : vector<8x8xf32> to vector<1x8x8xf32>
    tpu.vector_store %arg11[%c0_24, %c0_25, %c0_26], %40 {strides = array<i32>} : memref<1x8x8xf32, #tpu.memory_space<vmem>>, vector<1x8x8xf32>,
    %41 = vector.extract_strided_slice %15 {offsets = [0, 128], sizes = [8, 128], strides = [1, 1]} : vector<8x384xbf16> to vector<8x128xbf16>
    %42 = vector.extract_strided_slice %31 {offsets = [0, 128], sizes = [8, 128], strides = [1, 1]} : vector<8x384xbf16> to vector<8x128xbf16>
    %c0_27 = arith.constant 0 : index
    %c0_28 = arith.constant 0 : index
    %43 = vector.load %arg9[%c0_27, %c0_28] : memref<128x512xbf16, #tpu.memory_space<vmem>>, vector<128x512xbf16>
    %cst_29 = arith.constant dense<0.000000e+00> : vector<8x512xf32>
    %44 = tpu.matmul %41, %43, %cst_29 {dimension_numbers = #tpu.dot_dimension_numbers<[1], [0], [0], [1], [0, 0, 1, 1], [], []>} : vector<8x128xbf16>, vector<128x512xbf16>, vector<8x512xf32> -> vector<8x512xf32>
    %45 = arith.truncf %44 : vector<8x512xf32> to vector<8x512xbf16>
    %46 = vector.extract_strided_slice %45 {offsets = [0, 0], sizes = [8, 128], strides = [1, 1]} : vector<8x512xbf16> to vector<8x128xbf16>
    %cst_30 = arith.constant dense<0.000000e+00> : vector<8x8xf32>
    %47 = tpu.matmul %42, %46, %cst_30 {dimension_numbers = #tpu.dot_dimension_numbers<[1], [1], [0], [0], [0, 0, 1, 0], [], []>} : vector<8x128xbf16>, vector<8x128xbf16>, vector<8x8xf32> -> vector<8x8xf32>
    %48 = vector.extract_strided_slice %45 {offsets = [0, 128], sizes = [8, 128], strides = [1, 1]} : vector<8x512xbf16> to vector<8x128xbf16>
    %cst_31 = arith.constant dense<0.000000e+00> : vector<8x8xf32>
    %49 = tpu.matmul %42, %48, %cst_31 {dimension_numbers = #tpu.dot_dimension_numbers<[1], [1], [0], [0], [0, 0, 1, 0], [], []>} : vector<8x128xbf16>, vector<8x128xbf16>, vector<8x8xf32> -> vector<8x8xf32>
    %50 = vector.extract_strided_slice %45 {offsets = [0, 256], sizes = [8, 128], strides = [1, 1]} : vector<8x512xbf16> to vector<8x128xbf16>
    %cst_32 = arith.constant dense<0.000000e+00> : vector<8x8xf32>
    %51 = tpu.matmul %42, %50, %cst_32 {dimension_numbers = #tpu.dot_dimension_numbers<[1], [1], [0], [0], [0, 0, 1, 0], [], []>} : vector<8x128xbf16>, vector<8x128xbf16>, vector<8x8xf32> -> vector<8x8xf32>
    %52 = vector.extract_strided_slice %45 {offsets = [0, 384], sizes = [8, 128], strides = [1, 1]} : vector<8x512xbf16> to vector<8x128xbf16>
    %cst_33 = arith.constant dense<0.000000e+00> : vector<8x8xf32>
    %53 = tpu.matmul %42, %52, %cst_33 {dimension_numbers = #tpu.dot_dimension_numbers<[1], [1], [0], [0], [0, 0, 1, 0], [], []>} : vector<8x128xbf16>, vector<8x128xbf16>, vector<8x8xf32> -> vector<8x8xf32>
    %54 = tpu.concatenate %47, %49, %51, %53 in 1 : vector<8x8xf32>, vector<8x8xf32>, vector<8x8xf32>, vector<8x8xf32> -> vector<8x32xf32>
    %c0_34 = arith.constant 0 : index
    %c0_35 = arith.constant 0 : index
    %c0_36 = arith.constant 0 : index
    %55 = vector.load %arg12[%c0_34, %c0_35, %c0_36] : memref<1x8x32xf32, #tpu.memory_space<vmem>>, vector<1x8x32xf32>
    %56 = vector.shape_cast %55 : vector<1x8x32xf32> to vector<8x32xf32>
    %57 = vector.shape_cast %54 : vector<8x32xf32> to vector<1x8x32xf32>
    tpu.vector_store %arg12[%c0_34, %c0_35, %c0_36], %57 {strides = array<i32>} : memref<1x8x32xf32, #tpu.memory_space<vmem>>, vector<1x8x32xf32>,
    %58 = vector.extract_strided_slice %15 {offsets = [0, 256], sizes = [8, 128], strides = [1, 1]} : vector<8x384xbf16> to vector<8x128xbf16>
    %59 = vector.extract_strided_slice %31 {offsets = [0, 256], sizes = [8, 128], strides = [1, 1]} : vector<8x384xbf16> to vector<8x128xbf16>
    %c0_37 = arith.constant 0 : index
    %c0_38 = arith.constant 0 : index
    %60 = vector.load %arg10[%c0_37, %c0_38] : memref<128x128xbf16, #tpu.memory_space<vmem>>, vector<128x128xbf16>
    %cst_39 = arith.constant dense<0.000000e+00> : vector<8x128xf32>
    %61 = tpu.matmul %58, %60, %cst_39 {dimension_numbers = #tpu.dot_dimension_numbers<[1], [0], [0], [1], [0, 0, 1, 1], [], []>} : vector<8x128xbf16>, vector<128x128xbf16>, vector<8x128xf32> -> vector<8x128xf32>
    %62 = arith.truncf %61 : vector<8x128xf32> to vector<8x128xbf16>
    %cst_40 = arith.constant dense<0.000000e+00> : vector<8x8xf32>
    %63 = tpu.matmul %59, %62, %cst_40 {dimension_numbers = #tpu.dot_dimension_numbers<[1], [1], [0], [0], [0, 0, 1, 0], [], []>} : vector<8x128xbf16>, vector<8x128xbf16>, vector<8x8xf32> -> vector<8x8xf32>
    %c0_41 = arith.constant 0 : index
    %c0_42 = arith.constant 0 : index
    %c0_43 = arith.constant 0 : index
    %64 = vector.load %arg13[%c0_41, %c0_42, %c0_43] : memref<1x8x8xf32, #tpu.memory_space<vmem>>, vector<1x8x8xf32>
    %65 = vector.shape_cast %64 : vector<1x8x8xf32> to vector<8x8xf32>
    %66 = vector.shape_cast %63 : vector<8x8xf32> to vector<1x8x8xf32>
    tpu.vector_store %arg13[%c0_41, %c0_42, %c0_43], %66 {strides = array<i32>} : memref<1x8x8xf32, #tpu.memory_space<vmem>>, vector<1x8x8xf32>,
    return
  }
  func.func @transform_0(%arg0: i32, %arg1: i32) -> (i32, i32, i32) {
    %c0_i32 = arith.constant 0 : i32
    %c0_i32_0 = arith.constant 0 : i32
    %c0_i32_1 = arith.constant 0 : i32
    return %arg0, %c0_i32, %c0_i32_0 : i32, i32, i32
  }
  func.func @transform_1(%arg0: i32, %arg1: i32) -> (i32, i32, i32) {
    %c0_i32 = arith.constant 0 : i32
    %c0_i32_0 = arith.constant 0 : i32
    return %arg0, %arg1, %c0_i32 : i32, i32, i32
  }
  func.func @transform_2(%arg0: i32, %arg1: i32) -> (i32, i32) {
    %c0_i32 = arith.constant 0 : i32
    %c0_i32_0 = arith.constant 0 : i32
    %c0_i32_1 = arith.constant 0 : i32
    return %c0_i32, %c0_i32_0 : i32, i32
  }
  func.func @transform_3(%arg0: i32, %arg1: i32) -> (i32, i32) {
    %c0_i32 = arith.constant 0 : i32
    %c0_i32_0 = arith.constant 0 : i32
    %c0_i32_1 = arith.constant 0 : i32
    return %c0_i32, %c0_i32_0 : i32, i32
  }
  func.func @transform_4(%arg0: i32, %arg1: i32) -> (i32, i32) {
    %c0_i32 = arith.constant 0 : i32
    %c0_i32_0 = arith.constant 0 : i32
    %c0_i32_1 = arith.constant 0 : i32
    return %c0_i32, %c0_i32_0 : i32, i32
  }
  func.func @transform_5(%arg0: i32, %arg1: i32) -> (i32, i32) {
    %c0_i32 = arith.constant 0 : i32
    %c0_i32_0 = arith.constant 0 : i32
    %c0_i32_1 = arith.constant 0 : i32
    return %c0_i32, %c0_i32_0 : i32, i32
  }
  func.func @transform_6(%arg0: i32, %arg1: i32) -> (i32, i32) {
    %c0_i32 = arith.constant 0 : i32
    %c0_i32_0 = arith.constant 0 : i32
    %c0_i32_1 = arith.constant 0 : i32
    return %c0_i32, %c0_i32_0 : i32, i32
  }
  func.func @transform_7(%arg0: i32, %arg1: i32) -> (i32, i32) {
    %c0_i32 = arith.constant 0 : i32
    %c0_i32_0 = arith.constant 0 : i32
    %c0_i32_1 = arith.constant 0 : i32
    return %c0_i32, %c0_i32_0 : i32, i32
  }
  func.func @transform_8(%arg0: i32, %arg1: i32) -> (i32, i32) {
    %c0_i32 = arith.constant 0 : i32
    %c0_i32_0 = arith.constant 0 : i32
    %c0_i32_1 = arith.constant 0 : i32
    return %c0_i32, %c0_i32_0 : i32, i32
  }
  func.func @transform_9(%arg0: i32, %arg1: i32) -> (i32, i32, i32) {
    %c0_i32 = arith.constant 0 : i32
    %c0_i32_0 = arith.constant 0 : i32
    return %arg0, %arg1, %c0_i32 : i32, i32, i32
  }
  func.func @transform_10(%arg0: i32, %arg1: i32) -> (i32, i32, i32) {
    %c0_i32 = arith.constant 0 : i32
    %c0_i32_0 = arith.constant 0 : i32
    return %arg0, %arg1, %c0_i32 : i32, i32, i32
  }
  func.func @transform_11(%arg0: i32, %arg1: i32) -> (i32, i32, i32) {
    %c0_i32 = arith.constant 0 : i32
    %c0_i32_0 = arith.constant 0 : i32
    return %arg0, %arg1, %c0_i32 : i32, i32, i32
  }
}

</mosaic_0001>

<bundles_post_ra>
// kernel: tpu_custom_call.1
= control target key start
LH: loop header
LB: loop body
LE: loop exit
PB: predicated region body
PF: predicated region fallthrough
CT: control target
= control target key end

     0   :  { %s3324_s0 = inlined_call_operand.hbm [shape: bf16[2,8,32], index: 0, kind: input, shape index: {}]   ;;  %s3325_s1 = inlined_call_operand.hbm [shape: bf16[2,8,32], index: 1, kind: input, shape index: {}]   ;;  %s3326_s2 = inlined_call_operand.hbm [shape: bf16[32,384], index: 2, kind: input, shape index: {}]   ;;  %s3327_s3 = inlined_call_operand.vmem [shape: f32[1,384], index: 3, kind: input, shape index: {}]   ;;  %s3328_s4 = inlined_call_operand.hbm [shape: bf16[32,384], index: 4, kind: input, shape index: {}]   ;;  %s3329_s5 = inlined_call_operand.vmem [shape: f32[1,384], index: 5, kind: input, shape index: {}]   ;;  %s3330_s6 = inlined_call_operand.hbm [shape: bf16[128,128], index: 6, kind: input, shape index: {}]   ;;  %s3331_s7 = inlined_call_operand.hbm [shape: bf16[128,512], index: 7, kind: input, shape index: {}]   ;;  %s3332_s8 = inlined_call_operand.hbm [shape: bf16[128,128], index: 8, kind: input, shape index: {}]   ;;  %s3333_s9 = inlined_call_operand.hbm [shape: f32[2,8,8], index: 9, kind: output, shape index: {0}]   ;;  %s3334_s10 = inlined_call_operand.hbm [shape: f32[2,8,32], index: 10, kind: output, shape index: {1}]   ;;  %s3335_s11 = inlined_call_operand.hbm [shape: f32[2,8,8], index: 11, kind: output, shape index: {2}]  }
   0x1   :  { %3344 = sst [smem:[#allocation26_spill]] %s3326_s2 }
   0x2   :  { %3345 = sst [smem:[#allocation27_spill]] %s3328_s4 }
   0x3   :  { %3346 = sst [smem:[#allocation28_spill]] %s3329_s5 }
   0x4   :  { %3347 = sst [smem:[#allocation29_spill]] %s3330_s6 }
   0x5   :  { %3348 = sst [smem:[#allocation30_spill]] %s3331_s7 }
   0x6   :  { %3349 = sst [smem:[#allocation31_spill]] %s3332_s8 }
   0x7   :  { %3350 = sst [smem:[#allocation32_spill]] %s3333_s9 }
   0x8   :  { %3351 = sst [smem:[#allocation33_spill]] %s3334_s10 }
   0x9   :  { %3352 = sst [smem:[#allocation34_spill]] %s3335_s11 }
   0xa   :  { %17 = vsyncpa [#allocation3], 0 }
   0xb   :  { %19 = vsyncpa [#allocation3 + $0x1], 0 }
   0xc   :  { %20 = vsyncpa [#allocation6], 0 }
   0xd   :  { %22 = vsyncpa [#allocation6 + $0x1], 0 }
   0xe   :  { %23 = vsyncpa [#allocation9], 0 }
   0xf   :  { %24 = vsyncpa [#allocation12], 0 }
  0x10   :  { %25 = vsyncpa [#allocation4], 0 }
  0x11   :  { %27 = vsyncpa [#allocation4 + $0x1], 0 }
  0x12   :  { %28 = vsyncpa [#allocation16], 0 }
  0x13   :  { %30 = vsyncpa [#allocation16 + $0x1], 0  ;;  %s2797_s17 = smov 0   ;;  %s2799_s18 = smov 0  }
  0x14   :  { %s2801_s19 = smov 0   ;;  %s2803_s20 = smov 0  }
  0x15   :  { %s2805_s21 = smov 0   ;;  %s2807_s22 = smov 0  }
  0x16 LB: > { %3353 = sst [smem:[#allocation25_spill]] %s2705_s20  ;;  %s2828_s23 = sadd.s32 4294967295, %s2713_s22   ;;  %s2713_s22 = sphi %s2807_s22, %s36_s22   ;;  %s2709_s21 = sphi %s2805_s21, %s3389_s21   ;;  %s2705_s20 = sphi %s2803_s20, %s3388_s20   ;;  %s2701_s19 = sphi %s2801_s19, %s3387_s19   ;;  %s2697_s18 = sphi %s2799_s18, %s3386_s18   ;;  %s2693_s17 = sphi %s2797_s17, %s3385_s17  }
  0x17   : > { %p1895_p0 = scmp.ge.s32.totalorder %s2713_s22, 1  ;;  %p3339_p1 = scmp.eq.s32.totalorder %s2828_s23, 0 }
  0x18   : > { %p338_p2 = scmp.lt.s32.totalorder %s2713_s22, 3  ;;  %s2715_s25 = smov [#allocation7]  }
  0x19   : > { %s350_s26 = sshll.u32 %s2715_s25, 4  ;;  %s2716_s28 = smov [#allocation8]   ;;  %s2837_s26 = int_to_ptr.vmem [resolvable:$true] %s350_s26 }
  0x1a   : > { %p2833_p3 = pnand %p1895_p0, %p338_p2  ;;  %s366_s29 = sshll.u32 %s2716_s28, 4  ;;  %s2848_s29 = int_to_ptr.vmem [resolvable:$true] %s366_s29 }
  0x1b   : > { %s2717_s30 = smov [#allocation11]   ;;  %s3356_s2 = sld [smem:[#allocation26_spill]] }
  0x1c   : > { %s3354_s24 = scalar_select %p2833_p3, 1, 0 }
  0x1d   : > { %p2153_p4 = pneg %p2833_p3  ;;  %s2850_s12 = sshll.u32 %s2717_s30, 4  ;;  %s396_s12 = int_to_ptr.vmem [resolvable:$true] %s2850_s12 }
  0x1f   : > { %p2844_p6 = pnand %p2153_p4, %p3339_p1 }
  0x21   : > { %s2355_s15 = scalar_lea.hbm %s3356_s2, 768  ;;  %p2860_p8 = pneg %p2844_p6 }
  0x22   : > { %p2356_p7 = scmp.ne.s32.totalorder %s3356_s2, %s2355_s15  ;;  %p2362_p11 = scmp.lt.u32.totalorder %s2355_s15, %s3356_s2 }
  0x24   : > { %p2358_p9 = pnand %p2860_p8, %p2356_p7 }
  0x26   : > { %p2359_p10 = pneg %p2358_p9 }
  0x28   : > { %p2364_p12 = pnand %p2362_p11, %p2359_p10 }
  0x2a   : > { %2367 = shalt.err (!%p2364_p12)
}
  0x2b   : > { %s2368_s13 = scalar_lea.vmem %s2837_s26, 768  ;;  %p2376_p4 = scmp.lt.s32.totalorder %s2837_s26, %s2837_s26 }
  0x2c   : > { %p2369_p13 = scmp.ne.s32.totalorder %s2837_s26, %s2368_s13  ;;  %p2377_p5 = scmp.lt.s32.totalorder %s2368_s13, %s2368_s13 }
  0x2e   : > { %p2371_p0 = pnand %p2369_p13, %p2860_p8  ;;  %p2378_p7 = por %p2377_p5, %p2376_p4 }
  0x30   : > { %p2372_p2 = pneg %p2371_p0 }
  0x32   : > { %p2379_p9 = pnand %p2378_p7, %p2372_p2 }
  0x34   : > { %2382 = shalt.err (!%p2379_p9)
}
  0x35   : > { %s2718_s14 = smov 192   ;;  %s2719_s15 = smov 12  }
  0x36   : > { %2156 = dma.hbm_to_vmem [thread:$0]  (!%p2844_p6), %s3356_s2, 768, %s2837_s26, [#allocation6], %s2718_s14, %s2718_s14, %s2719_s15  }
  0x37   : > { %s3358_s4 = sld [smem:[#allocation27_spill]] }
  0x3d   : > { %s2383_s9 = scalar_lea.hbm %s3358_s4, 768 }
  0x3e   : > { %p2384_p5 = scmp.ne.s32.totalorder %s3358_s4, %s2383_s9  ;;  %p2390_p12 = scmp.lt.u32.totalorder %s2383_s9, %s3358_s4 }
  0x40   : > { %p2386_p10 = pnand %p2384_p5, %p2860_p8 }
  0x42   : > { %p2387_p11 = pneg %p2386_p10 }
  0x44   : > { %p2392_p13 = pnand %p2390_p12, %p2387_p11 }
  0x46   : > { %2395 = shalt.err (!%p2392_p13)
}
  0x47   : > { %s2396_s26 = scalar_lea.vmem %s2848_s29, 768  ;;  %p2404_p7 = scmp.lt.s32.totalorder %s2848_s29, %s2848_s29 }
  0x48   : > { %p2397_p0 = scmp.ne.s32.totalorder %s2848_s29, %s2396_s26  ;;  %p2405_p9 = scmp.lt.s32.totalorder %s2396_s26, %s2396_s26 }
  0x4a   : > { %p2399_p2 = pnand %p2397_p0, %p2860_p8  ;;  %p2406_p5 = por %p2405_p9, %p2404_p7 }
  0x4c   : > { %p2400_p4 = pneg %p2399_p2 }
  0x4e   : > { %p2407_p10 = pnand %p2406_p5, %p2400_p4 }
  0x50   : > { %2410 = shalt.err (!%p2407_p10)
}
  0x51   : > { %2159 = dma.hbm_to_vmem [thread:$0]  (!%p2844_p6), %s3358_s4, 768, %s2848_s29, [#allocation9], %s2718_s14, %s2718_s14, %s2719_s15  }
  0x52   : > { %s3359_s7 = sld [smem:[#allocation30_spill]] }
  0x58   : > { %s2411_s16 = scalar_lea.hbm %s3359_s7, 4096 }
  0x59   : > { %p2412_p11 = scmp.ne.s32.totalorder %s3359_s7, %s2411_s16  ;;  %p2418_p0 = scmp.lt.u32.totalorder %s2411_s16, %s3359_s7 }
  0x5b   : > { %p2414_p12 = pnand %p2412_p11, %p2860_p8 }
  0x5d   : > { %p2415_p13 = pneg %p2414_p12 }
  0x5f   : > { %p2420_p2 = pnand %p2418_p0, %p2415_p13 }
  0x61   : > { %2423 = shalt.err (!%p2420_p2)
}
  0x62   : > { %s2424_s26 = scalar_lea.vmem %s396_s12, 4096  ;;  %p2432_p5 = scmp.lt.s32.totalorder %s396_s12, %s396_s12 }
  0x63   : > { %p2425_p4 = scmp.ne.s32.totalorder %s396_s12, %s2424_s26  ;;  %p2433_p10 = scmp.lt.s32.totalorder %s2424_s26, %s2424_s26 }
  0x65   : > { %p2427_p7 = pnand %p2425_p4, %p2860_p8  ;;  %p2434_p1 = por %p2433_p10, %p2432_p5 }
  0x67   : > { %p2428_p9 = pneg %p2427_p7 }
  0x69   : > { %p2435_p3 = pnand %p2434_p1, %p2428_p9 }
  0x6b   : > { %2438 = shalt.err (!%p2435_p3)
}
  0x6c   : > { %s2720_s29 = smov 256   ;;  %s2721_s14 = smov 16  }
  0x6d   : > { %2165 = dma.hbm_to_vmem [thread:$0]  (!%p2844_p6), %s3359_s7, 4096, %s396_s12, [#allocation12], %s2720_s29, %s2720_s29, %s2721_s14  }
  0x6e   : > { %s2722_s9 = smov [#allocation10]   ;;  %s3360_s6 = sld [smem:[#allocation29_spill]] }
  0x6f   : > { %s382_s10 = sshll.u32 %s2722_s9, 4  ;;  %s383_s10 = int_to_ptr.vmem [resolvable:$true] %s382_s10 }
  0x74   : > { %s2439_s25 = scalar_lea.hbm %s3360_s6, 1024 }
  0x75   : > { %p2440_p1 = scmp.ne.s32.totalorder %s3360_s6, %s2439_s25  ;;  %p2446_p12 = scmp.lt.u32.totalorder %s2439_s25, %s3360_s6 }
  0x77   : > { %p2442_p3 = pnand %p2440_p1, %p2860_p8 }
  0x79   : > { %p2443_p11 = pneg %p2442_p3 }
  0x7b   : > { %p2448_p13 = pnand %p2446_p12, %p2443_p11 }
  0x7d   : > { %2451 = shalt.err (!%p2448_p13)
}
  0x7e   : > { %s2452_s12 = scalar_lea.vmem %s383_s10, 1024  ;;  %p2460_p7 = scmp.lt.s32.totalorder %s383_s10, %s383_s10 }
  0x7f   : > { %p2453_p0 = scmp.ne.s32.totalorder %s383_s10, %s2452_s12  ;;  %p2461_p9 = scmp.lt.s32.totalorder %s2452_s12, %s2452_s12 }
  0x81   : > { %p2455_p2 = pnand %p2453_p0, %p2860_p8  ;;  %p2462_p5 = por %p2461_p9, %p2460_p7 }
  0x83   : > { %p2456_p4 = pneg %p2455_p2 }
  0x85   : > { %p2463_p10 = pnand %p2462_p5, %p2456_p4 }
  0x87   : > { %2466 = shalt.err (!%p2463_p10)
}
  0x88   : > { %s2723_s29 = smov 64   ;;  %s2724_s14 = smov 4  }
  0x89   : > { %2162 = dma.hbm_to_vmem [thread:$0]  (!%p2844_p6), %s3360_s6, 1024, %s383_s10, [#allocation9], %s2723_s29, %s2723_s29, %s2724_s14  }
  0x8a   : > { %s2725_s9 = smov [#allocation13]   ;;  %s3361_s8 = sld [smem:[#allocation31_spill]] }
  0x8b   : > { %s408_s20 = sshll.u32 %s2725_s9, 4  ;;  %s409_s20 = int_to_ptr.vmem [resolvable:$true] %s408_s20 }
  0x90   : > { %s2467_s28 = scalar_lea.hbm %s3361_s8, 1024 }
  0x91   : > { %p2468_p1 = scmp.ne.s32.totalorder %s3361_s8, %s2467_s28  ;;  %p2474_p12 = scmp.lt.u32.totalorder %s2467_s28, %s3361_s8 }
  0x93   : > { %p2470_p3 = pnand %p2468_p1, %p2860_p8 }
  0x95   : > { %p2471_p11 = pneg %p2470_p3 }
  0x97   : > { %p2476_p13 = pnand %p2474_p12, %p2471_p11 }
  0x99   : > { %2479 = shalt.err (!%p2476_p13)
}
  0x9a   : > { %s2480_s10 = scalar_lea.vmem %s409_s20, 1024  ;;  %p2488_p7 = scmp.lt.s32.totalorder %s409_s20, %s409_s20 }
  0x9b   : > { %p2481_p0 = scmp.ne.s32.totalorder %s409_s20, %s2480_s10  ;;  %p2489_p9 = scmp.lt.s32.totalorder %s2480_s10, %s2480_s10 }
  0x9d   : > { %p2483_p2 = pnand %p2481_p0, %p2860_p8  ;;  %p2490_p5 = por %p2489_p9, %p2488_p7 }
  0x9f   : > { %p2484_p4 = pneg %p2483_p2 }
  0xa1   : > { %p2491_p10 = pnand %p2490_p5, %p2484_p4 }
  0xa3   : > { %2494 = shalt.err (!%p2491_p10)
}
  0xa4   : > { %2168 = dma.hbm_to_vmem [thread:$0]  (!%p2844_p6), %s3361_s8, 1024, %s409_s20, [#allocation12], %s2723_s29, %s2723_s29, %s2724_s14  }
  0xa5   : > { %s3341_s11 = sadd.s32 4294967294, %s2713_s22   ;;  %s48_s27 = sadd.s32 1, %s2709_s21 }
  0xa6   : > { %s55_s9 = sadd.s32 1, %s2701_s19  ;;  %p50_p8 = scmp.ge.s32.totalorder %s48_s27, 2 }
  0xa7   : > { %p62_p1 = scmp.ne.s32.totalorder %s2701_s19, %s2697_s18  ;;  %p63_p3 = scmp.eq.s32.totalorder %s2713_s22, 0 }
  0xa8   : > { %p68_p11 = scmp.ne.s32.totalorder %s2697_s18, %s2693_s17  ;;  %s3391_s27 = smov (%p50_p8, %s48_s27), 0 }
  0xa9   : > { %p2969_p12 = por %p63_p3, %p62_p1  ;;  %p3363_p13 = scmp.eq.s32.totalorder %s2828_s23, 0 }
  0xaa   : > { %s52_s14 = ssub.s32 %s2709_s21, %s3391_s27  ;;  %p269_p0 = scmp.eq.s32.totalorder %s2828_s23, 1 }
  0xab   : > { %p2975_p6 = por %p3363_p13, %p68_p11  ;;  %p53_p2 = scmp.eq.s32.totalorder %s52_s14, 0 }
  0xac   : > { %p275_p4 = scmp.eq.s32.totalorder %s3341_s11, 1  ;;  %p2984_p7 = por %p269_p0, %p62_p1 }
  0xad   : > { %s3364_s29 = scalar_select %p2975_p6, 1, 0 }
  0xae   : > { %s3365_s20 = scalar_select %p2984_p7, 1, 0 }
  0xaf   : > { %p2191_p9 = scmp.lt.s32.totalorder %s2713_s22, 2  ;;  %p2992_p5 = por %p275_p4, %p68_p11 }
  0xb0   : > { %s2990_s25 = scalar_select %p53_p2, %s2701_s19, %s55_s9  }
  0xb1   : > { %s3366_s28 = scalar_select %p2992_p5, 1, 0 }
  0xb2   : > { %s422_s30 = sand.u32 1, %s2701_s19   ;;  %s1903_s26 = sshll.u32 %s2709_s21, 6 }
  0xb3   : > { %s2997_s13 = sshll.u32 %s422_s30, 2  ;;  %s3003_s15 = scalar_lea.hbm %s3324_s0, %s1903_s26 }
  0xb4   : > { %s426_s5 = scalar_lea.vmem [#allocation2], %s2997_s13  ;;  %p3010_p10 = pnand %p2191_p9, %p2969_p12 }
  0xb5   : > { %s433_s9 = sshll.u32 %s426_s5, 4  ;;  %s3017_s12 = scalar_lea.hbm %s3325_s1, %s1903_s26  ;;  %s3006_s9 = int_to_ptr.vmem [resolvable:$true] %s433_s9 }
  0xb6   : > { %s440_s10 = sand.u32 1, %s2713_s22   ;;  %s423_s4 = scalar_lea.sflag [#allocation3], %s422_s30 }
  0xb7   : > { %s2495_s6 = scalar_lea.hbm %s3003_s15, 64  ;;  %p2497_p1 = pneg %p3010_p10 }
  0xb8   : > { %p2496_p8 = scmp.ne.s32.totalorder %s3003_s15, %s2495_s6  ;;  %s2500_s7 = scalar_lea.hbm %s3324_s0, 128 }
  0xb9   : > { %p2501_p12 = scmp.lt.u32.totalorder %s3003_s15, %s3324_s0  ;;  %p2502_p13 = scmp.lt.u32.totalorder %s2500_s7, %s2495_s6 }
  0xba   : > { %p2498_p3 = pnand %p2497_p1, %p2496_p8  ;;  %p2504_p2 = scmp.lt.u32.totalorder %s2495_s6, %s3003_s15 }
  0xbb   : > { %p2503_p0 = por %p2502_p13, %p2501_p12 }
  0xbc   : > { %p2499_p11 = pneg %p2498_p3 }
  0xbd   : > { %p2505_p4 = por %p2504_p2, %p2503_p0 }
  0xbf   : > { %p2506_p9 = pnand %p2505_p4, %p2499_p11 }
  0xc1   : > { %2509 = shalt.err (!%p2506_p9)
}
  0xc2   : > { %s2510_s11 = scalar_lea.vmem %s3006_s9, 64  ;;  %s2726_s30 = smov [#allocation2]  }
  0xc3   : > { %p2511_p8 = scmp.ne.s32.totalorder %s3006_s9, %s2510_s11  ;;  %s2515_s26 = sshll.u32 %s2726_s30, 4  ;;  %s2516_s26 = int_to_ptr.vmem [resolvable:$false] %s2515_s26 }
  0xc4   : > { %s2517_s8 = scalar_lea.vmem %s2516_s26, 128  ;;  %p2518_p7 = scmp.lt.s32.totalorder %s3006_s9, %s2516_s26 }
  0xc5   : > { %p2513_p3 = pnand %p2511_p8, %p2497_p1  ;;  %p2519_p12 = scmp.lt.s32.totalorder %s2517_s8, %s2510_s11 }
  0xc7   : > { %p2514_p5 = pneg %p2513_p3  ;;  %p2520_p13 = por %p2519_p12, %p2518_p7 }
  0xc9   : > { %p2521_p0 = pnand %p2520_p13, %p2514_p5 }
  0xcb   : > { %2524 = shalt.err (!%p2521_p0)
}
  0xcc   : > { %2172 = dma.hbm_to_vmem [thread:$0]  (!%p3010_p10), %s3003_s15, 64, %s3006_s9, %s423_s4  }
  0xcd   : > { %s444_s6 = scalar_lea.vmem [#allocation5], %s2997_s13  ;;  %s441_s16 = scalar_lea.sflag [#allocation6], %s440_s10 }
  0xce   : > { %s452_s7 = sshll.u32 %s444_s6, 4  ;;  %s2525_s5 = scalar_lea.hbm %s3017_s12, 64  ;;  %s453_s7 = int_to_ptr.vmem [resolvable:$true] %s452_s7 }
  0xcf   : > { %p2526_p7 = scmp.ne.s32.totalorder %s3017_s12, %s2525_s5  ;;  %s2530_s30 = scalar_lea.hbm %s3325_s1, 128 }
  0xd0   : > { %p2531_p2 = scmp.lt.u32.totalorder %s3017_s12, %s3325_s1  ;;  %p2532_p4 = scmp.lt.u32.totalorder %s2530_s30, %s2525_s5 }
  0xd1   : > { %p2528_p5 = pnand %p2526_p7, %p2497_p1  ;;  %p2534_p8 = scmp.lt.u32.totalorder %s2525_s5, %s3017_s12 }
  0xd2   : > { %p2533_p9 = por %p2532_p4, %p2531_p2 }
  0xd3   : > { %p2529_p11 = pneg %p2528_p5 }
  0xd4   : > { %p2535_p3 = por %p2534_p8, %p2533_p9 }
  0xd6   : > { %p2536_p12 = pnand %p2535_p3, %p2529_p11 }
  0xd8   : > { %2539 = shalt.err (!%p2536_p12)
}
  0xd9   : > { %s2540_s4 = scalar_lea.vmem %s453_s7, 64  ;;  %s2727_s13 = smov [#allocation5]  }
  0xda   : > { %p2541_p13 = scmp.ne.s32.totalorder %s453_s7, %s2540_s4  ;;  %s2545_s15 = sshll.u32 %s2727_s13, 4  ;;  %s2546_s15 = int_to_ptr.vmem [resolvable:$false] %s2545_s15 }
  0xdb   : > { %s2547_s9 = scalar_lea.vmem %s2546_s15, 128  ;;  %p2548_p5 = scmp.lt.s32.totalorder %s453_s7, %s2546_s15 }
  0xdc   : > { %p2543_p0 = pnand %p2541_p13, %p2497_p1  ;;  %p2549_p6 = scmp.lt.s32.totalorder %s2547_s9, %s2540_s4 }
  0xde   : > { %p2544_p7 = pneg %p2543_p0  ;;  %p2550_p2 = por %p2549_p6, %p2548_p5 }
  0xe0   : > { %p2551_p4 = pnand %p2550_p2, %p2544_p7 }
  0xe2   : > { %2554 = shalt.err (!%p2551_p4)
}
  0xe3   : > { %2175 = dma.hbm_to_vmem [thread:$0]  (!%p3010_p10), %s3017_s12, 64, %s453_s7, %s441_s16  }
  0xe4   : > { %p3368_p11 = scmp.ne.s32.totalorder %s3354_s24, 0 }
  0xe5   : > { %s3070_s10 = sand.u32 (!%p3368_p11), 1, %s2697_s18   ;;  %p3369_p1 = scmp.ne.s32.totalorder (!%p3368_p11), %s3364_s29, 0 }
  0xe6   : > { %461 = sbr.rel (%p3368_p11) target bundleno = 1464 (0x5b8), region = 56  ;;  %s1907_s6 = sshll.u32 (!%p3368_p11), %s3070_s10, 2 }
  0xe7   : > { %s464_s5 = scalar_lea.sflag (!%p3368_p11), [#allocation3], %s3070_s10  ;;  %s467_s2 = scalar_lea.vmem (!%p3368_p11), [#allocation2], %s1907_s6 }
  0xed   : > { %2664 = dma.done.wait (%p3369_p1), %s464_s5, 64  }
  0xee   : > { %2666 = vsyncadd (%p3369_p1), %s464_s5, 4294967232  ;;  %s472_s14 = sand.u32 1, %s2828_s23   ;;  %s3081_s12 = scalar_lea.vmem [#allocation5], %s1907_s6 }
  0xef   : > { %s473_s24 = scalar_lea.sflag [#allocation6], %s472_s14 }
  0xf0   : > { %2668 = dma.done.wait (%p3369_p1), %s473_s24, 64  }
  0xf1   : > { %2670 = vsyncadd (%p3369_p1), %s473_s24, 4294967232  ;;  %p3370_p6 = scmp.eq.s32.totalorder %s2828_s23, 0 }
  0xf3   : > { %2672 = dma.done.wait (%p3370_p6), [#allocation6], 768   ;;  %p3371_p10 = pmov %p3370_p6 }
  0xf4   : > { %p3372_p9 = pmov %p3370_p6 }
  0xf5   : > { %2674 = vsyncadd (%p3371_p10), [#allocation6], 4294966528 }
  0xf6   : > { %2676 = dma.done.wait (%p3372_p9), [#allocation9], 1792   ;;  %p3373_p8 = pmov %p3370_p6 }
  0xf7   : > { %p3374_p3 = pmov %p3370_p6 }
  0xf8   : > { %2678 = vsyncadd (%p3373_p8), [#allocation9], 4294965504 }
  0xf9   : > { %2680 = dma.done.wait (%p3374_p3), [#allocation12], 5120   ;;  %p3375_p12 = pmov %p3374_p3 }
  0xfa   : > { %v2728_v0 = vmov 0   ;;  %v2729_v1 = vmov 0.0   ;;  %vm2730_vm0 = vmmov 0   ;;  %v2263_v2 = vld [vmem:[#allocation7 + $0x4] ss:$12 sps:$4 sm:$0xff]   ;;  %vm609_vm1 = vcmask 261120  }
  0xfb   : > { %2682 = vsyncadd (%p3375_p12), [#allocation12], 4294962176  ;;  %645 = vmatprep.mubr.bf16.mxu0 %v2728_v0  ;;  %2039 = vmatprep.subr.bf16.mxu1 %v2729_v1  ;;  %v2265_v3 = vld [vmem:[#allocation7] ss:$12 sps:$4 sm:$0xff]   ;;  %v2266_v4 = vld [vmem:[#allocation7 + $0x1c] ss:$12 sps:$4 sm:$0xff]   ;;  %v562_v25 = vlaneseq }
  0xfc   : > { %2043 = vmatprep.mubr.msk.bf16.mxu1 %vm2730_vm0, %v2729_v1  ;;  %613 = vmatprep.subr.bf16.mxu0 %v2263_v2  ;;  %v2268_v5 = vld [vmem:[#allocation7 + $0x18] ss:$12 sps:$4 sm:$0xff]   ;;  %v551_v6 = vld [vmem:[%s467_s2] sm:$0xf]  ;;  %v2270_v8 = vld [vmem:[#allocation7 + $0x20] ss:$12 sps:$4 sm:$0xff]  }
  0xfd   : > { %614 = vmatpush1.bf16.msra.mxu0 %v2265_v3  ;;  %v2269_v7 = vld [vmem:[#allocation7 + $0x8] ss:$12 sps:$4 sm:$0xff]   ;;  %v2271_v10 = vld [vmem:[#allocation8] ss:$12 sps:$4 sm:$0xff]   ;;  %v2276_v11 = vld [vmem:[#allocation8 + $0x1c] ss:$12 sps:$4 sm:$0xff]  }
  0xfe   : > { %615 = vmatprep.subr.bf16.mxu0 %v2266_v4  ;;  %v2273_v9 = vld [vmem:[#allocation8 + $0x4] ss:$12 sps:$4 sm:$0xff]   ;;  %v715_v13 = vld [vmem:[%s3081_s12] sm:$0xf]  ;;  %v2278_v15 = vld [vmem:[#allocation10 + $0x8] sm:$0xff]   ;;  %v3127_v26 = vshrl.u32 %v562_v25, 7 }
  0xff   : > { %v2274_v12 = vld [vmem:[#allocation8 + $0x18] ss:$12 sps:$4 sm:$0xff]   ;;  %v2277_v14 = vld [vmem:[#allocation10] sm:$0xff]   ;;  %v2280_v17 = vld [vmem:[#allocation10 + $0x18] sm:$0xff]   ;;  %s3376_s30 = sld [smem:[#allocation28_spill]]  ;;  %s3174_s26 = sshll.u32 %s3070_s10, 3 }
 0x100   : > { %v2279_v16 = vld [vmem:[#allocation10 + $0x10] sm:$0xff]   ;;  %v2281_v18 = vld [vmem:[#allocation10 + $0x20] sm:$0xff]   ;;  %v2282_v19 = vld [vmem:[#allocation10 + $0x28] sm:$0xff]   ;;  %v564_v27 = vsub.s32 0, %v3127_v26  ;;  %v568_v42 = vsub.s32 1, %v3127_v26  ;;  %vm1023_vm6 = vcmask 64512  }
 0x101   : > { %616 = vmatpush1.bf16.msra.mxu0 %v2268_v5  ;;  %v2283_v20 = vld [vmem:[#allocation10 + $0x30] sm:$0xff]   ;;  %v2284_v21 = vld [vmem:[#allocation10 + $0x38] sm:$0xff]   ;;  %s535_s8 = scalar_lea.vmem [#allocation14], %s3174_s26  ;;  %s2731_s4 = smov 24   ;;  %vm1476_vm9 = vcmask 130048   ;;  %vm1478_vm10 = vcmask 195584  }
 0x102   : > { %2031 = vmatprep.subr.bf16.mxu0 %v2729_v1  ;;  %v2287_v22 = vld [vmem:[#allocation11 + $0xc] ss:$16 sps:$4 sm:$0xff]   ;;  %v2309_v23 = vld [vmem:[#allocation8 + $0x8] ss:$12 sps:$4 sm:$0xff]   ;;  %v3133_v28 = vld [vmem:[%s3327_s3] sm:$0x7] }
 0x103   : > { %2040 = vmatpush3.bf16.msra.mxu1 %v2309_v23  ;;  %v2310_v24 = vld [vmem:[#allocation8 + $0x20] ss:$12 sps:$4 sm:$0xff]   ;;  %v565_v29 = vrot.slane %v3133_v28, %v564_v27  ;;  %v569_v46 = vrot.slane %v3133_v28, %v568_v42  ;;  %v2285_v53 = vld [vmem:[#allocation11 + $0x8] ss:$16 sps:$4 sm:$0xff]   ;;  %s2732_s13 = smov 8   ;;  %s2733_s15 = smov 16  }
 0x104   : > { %1923 = vmatmul.mubr.msk.bf16.vlgmr.msra.gmra.mrb[0].mxu0 %vm609_vm1, %v551_v6  ;;  %2041 = vmatprep.subr.bf16.mxu1 %v2729_v1  ;;  %v2290_v56 = vld [vmem:[#allocation11 + $0x2c] ss:$16 sps:$4 sm:$0xff]   ;;  %v2288_v57 = vld [vmem:[#allocation11 + $0x28] ss:$16 sps:$4 sm:$0xff]   ;;  %s3377_s9 = sld [smem:[#allocation25_spill]]  ;;  %s542_s6 = scalar_lea.vmem [#allocation15], %s3174_s26 }
 0x105   : > { %2032 = vmatpush3.bf16.msra.mxu0 %v2269_v7  ;;  %2035 = vmatprep.mubr.msk.bf16.mxu0 %vm2730_vm0, %v2729_v1  ;;  %v3143_v41 = vld [vmem:[%s3376_s30] sm:$0x7]  ;;  %v2293_v59 = vld [vmem:[#allocation11 + $0x4c] ss:$16 sps:$4 sm:$0xff]   ;;  %v2291_v60 = vld [vmem:[#allocation11 + $0x48] ss:$16 sps:$4 sm:$0xff]  }
 0x106   : > { %2033 = vmatprep.subr.bf16.mxu0 %v2729_v1  ;;  %v733_v43 = vrot.slane %v3143_v41, %v568_v42  ;;  %v2296_v62 = vld [vmem:[#allocation11 + $0x6c] ss:$16 sps:$4 sm:$0xff]   ;;  %v2294_v63 = vld [vmem:[#allocation11 + $0x68] ss:$16 sps:$4 sm:$0xff]   ;;  %v2322_v42 = vld [vmem:[#allocation11 + $0x64] ss:$16 sps:$4 sm:$0xff]  }
 0x107   : > { %2042 = vmatpush3.bf16.msra.mxu1 %v2310_v24  ;;  %v2299_v2 = vld [vmem:[#allocation11 + $0x8c] ss:$16 sps:$4 sm:$0xff]   ;;  %v2297_v3 = vld [vmem:[#allocation11 + $0x88] ss:$16 sps:$4 sm:$0xff]   ;;  %v2313_v24 = vld [vmem:[#allocation11 + $0x4] ss:$16 sps:$4 sm:$0xff]  }
 0x108   : > { %2067 = vmatprep.subr.bf16.mxu1 %v2729_v1  ;;  %v2302_v4 = vld [vmem:[#allocation11 + $0xac] ss:$16 sps:$4 sm:$0xff]   ;;  %v2300_v5 = vld [vmem:[#allocation11 + $0xa8] ss:$16 sps:$4 sm:$0xff]   ;;  %s3378_s12 = sld [smem:[#allocation33_spill]]  ;;  %s1666_s7 = sshll.u32 %s542_s6, 4  ;;  %s3213_s7 = int_to_ptr.vmem [resolvable:$true] %s1666_s7 }
 0x109   : > { %2034 = vmatpush3.bf16.msra.mxu0 %v2270_v8  ;;  %v2303_v8 = vld [vmem:[#allocation11 + $0xc8] ss:$16 sps:$4 sm:$0xff]   ;;  %s3379_s30 = sld [smem:[#allocation32_spill]]  ;;  %p3380_p0 = scmp.ne.s32.totalorder %s3365_s20, 0 }
 0x10a   : > { %776 = vmatprep.subr.bf16.mxu0 %v2273_v9  ;;  %2044 = vmatmul.mubr.msk.bf16.vlgmr.msra.gmra.mrb[0].mxu1 %vm609_vm1, %v715_v13  ;;  %v2308_v9 = vld [vmem:[#allocation11 + $0xec] ss:$16 sps:$4 sm:$0xff]   ;;  %s3205_s5 = sshll.u32 %s3377_s9, 7  ;;  %s2734_s9 = smov [#allocation15]  }
 0x10b   : > { %2069 = vmatprep.mubr.msk.bf16.mxu1 %vm2730_vm0, %v2729_v1 }
 0x10c   : > { %2036 = vmatmul.mubr.msk.bf16.vlgmr.msra.gmra.mrb[4].mxu0 %vm609_vm1, %v551_v6  ;;  %v2305_v6 = vld [vmem:[#allocation11 + $0xcc] ss:$16 sps:$4 sm:$0xff]  }
 0x10d   : > { %777 = vmatpush1.bf16.msra.mxu0 %v2271_v10  ;;  %808 = vmatprep.mubr.bf16.mxu0 %v2728_v0 }
 0x10e   : > { %778 = vmatprep.subr.bf16.mxu0 %v2276_v11  ;;  %v2306_v11 = vld [vmem:[#allocation11 + $0xe8] ss:$16 sps:$4 sm:$0xff]   ;;  %s3211_s29 = scalar_lea.hbm %s3378_s12, %s3205_s5 }
 0x111   : > { %779 = vmatpush1.bf16.msra.mxu0 %v2274_v12 }
 0x112   : > { %2047 = vmatprep.subr.bf16.mxu0 %v2729_v1 }
 0x114   : > { %1934 = vmatmul.mubr.msk.bf16.vlgmr.msra.gmra.mrb[8].mxu0 %vm609_vm1, %v715_v13 }
 0x115   : > { %2048 = vmatpush3.bf16.msra.mxu0 %v2277_v14  ;;  %2063 = vmatprep.mubr.msk.bf16.mxu0 %vm2730_vm0, %v2729_v1 }
 0x116   : > { %2049 = vmatprep.subr.bf16.mxu0 %v2729_v1 }
 0x119   : > { %2050 = vmatpush3.bf16.msra.mxu0 %v2278_v15 }
 0x11a   : > { %2051 = vmatprep.subr.bf16.mxu0 %v2729_v1 }
 0x11d   : > { %2052 = vmatpush3.bf16.msra.mxu0 %v2279_v16 }
 0x11e   : > { %2053 = vmatprep.subr.bf16.mxu0 %v2729_v1 }
 0x121   : > { %2054 = vmatpush3.bf16.msra.mxu0 %v2280_v17 }
 0x122   : > { %2055 = vmatprep.subr.bf16.mxu0 %v2729_v1 }
 0x125   : > { %2056 = vmatpush3.bf16.msra.mxu0 %v2281_v18  ;;  %v729_v18 = vrot.slane %v3143_v41, %v564_v27  ;;  %v2314_v27 = vld [vmem:[#allocation11 + $0x20] ss:$16 sps:$4 sm:$0xff]  }
 0x126   : > { %2057 = vmatprep.subr.bf16.mxu0 %v2729_v1 }
 0x129   : > { %2058 = vmatpush3.bf16.msra.mxu0 %v2282_v19 }
 0x12a   : > { %2059 = vmatprep.subr.bf16.mxu0 %v2729_v1 }
 0x12d   : > { %2060 = vmatpush3.bf16.msra.mxu0 %v2283_v20 }
 0x12e   : > { %2061 = vmatprep.subr.bf16.mxu0 %v2729_v1 }
 0x131   : > { %2062 = vmatpush3.bf16.msra.mxu0 %v2284_v21 }
 0x132   : > { %1258 = vmatprep.subr.bf16.mxu0 %v2287_v22 }
 0x1d7   : > { %v647_v30 = vpop.f32.mrb[0].mxu0 }
 0x1d8   : > { %v648_v31 = vadd.f32 %v647_v30, %v565_v29  ;;  %v649_v32 = vpop.f32.mrb[1].mxu0 }
 0x1d9   : > { %v651_v33 = vpop.f32.mrb[2].mxu0  ;;  %v650_v55 = vadd.f32 %v649_v32, %v569_v46  ;;  %v2323_v46 = vld [vmem:[#allocation11 + $0x80] ss:$16 sps:$4 sm:$0xff]  }
 0x1da   : > { %v697_v34 = vmin.f32 %v648_v31, 0.0  ;;  %v652_v35 = vpop.f32.mrb[3].mxu0  ;;  %vm694_vm2 = vcmp.gt.f32.partialorder %v648_v31, 0.0 }
 0x1db   : > { %v698_v58 = vmin.f32 %v650_v55, 0.0  ;;  %vm695_vm3 = vcmp.gt.f32.partialorder %v650_v55, 0.0 }
 0x1dc   : > { %v700_v36 = vmul.f32 1.442695, %v697_v34  ;;  %v2311_v34 = vld [vmem:[#allocation11] ss:$16 sps:$4 sm:$0xff]  }
 0x1dd   : > { %v702_v61 = vmul.f32 1.442695, %v698_v58  ;;  %v3157_v14 = vpop.f32.mrb[0].mxu1 }
 0x1de   : > { %2343 = vpow2.f32 %v700_v36  ;;  %v2045_v15 = vpop.f32.mrb[1].mxu1  ;;  %v2316_v36 = vld [vmem:[#allocation11 + $0x24] ss:$16 sps:$4 sm:$0xff]  }
 0x1df   : > { %v3138_v37 = vpop.f32.mrb[4].mxu0  ;;  %2345 = vpow2.f32 %v702_v61  ;;  %v854_v16 = vpop.f32.mrb[2].mxu1 }
 0x1e0   : > { %v2037_v38 = vpop.f32.mrb[5].mxu0  ;;  %v2046_v17 = vpop.f32.mrb[3].mxu1 }
 0x1e1   : > { %v691_v39 = vpop.f32.mrb[6].mxu0  ;;  %v2319_v38 = vld [vmem:[#allocation11 + $0x44] ss:$16 sps:$4 sm:$0xff]  }
 0x1e2   : > { %v2038_v40 = vpop.f32.mrb[7].mxu0  ;;  %v2335_v17 = vld [vmem:[#allocation13] sm:$0xff]  }
 0x1e3   : > { %v2317_v40 = vld [vmem:[#allocation11 + $0x40] ss:$16 sps:$4 sm:$0xff]  }
 0x1e7   : > { %v810_v44 = vpop.f32.mrb[8].mxu0 }
 0x1e8   : > { %v2344_v45 = vpop.eup %2343  ;;  %v812_v47 = vpop.f32.mrb[9].mxu0  ;;  %v811_v19 = vadd.f32 %v810_v44, %v729_v18  ;;  %v2320_v44 = vld [vmem:[#allocation11 + $0x60] ss:$16 sps:$4 sm:$0xff]  }
 0x1e9   : > { %v1925_v48 = vadd.f32 -1.0, %v2344_v45  ;;  %v3148_v49 = vadd.f32 %v812_v47, %v733_v43  ;;  %v814_v50 = vpop.f32.mrb[10].mxu0  ;;  %v2346_v7 = vpop.eup %2345  ;;  %v2325_v45 = vld [vmem:[#allocation11 + $0x84] ss:$16 sps:$4 sm:$0xff]  }
 0x1ea   : > { %v815_v51 = vpop.f32.mrb[11].mxu0  ;;  %v1926_v10 = vadd.f32 -1.0, %v2346_v7  ;;  %v860_v20 = vmin.f32 %v811_v19, 0.0  ;;  %vm857_vm4 = vcmp.gt.f32.partialorder %v811_v19, 0.0  ;;  %v2328_v47 = vld [vmem:[#allocation11 + $0xa4] ss:$16 sps:$4 sm:$0xff]  }
 0x1eb   : > { %v709_v52 = vsel %vm694_vm2, %v648_v31, %v1925_v48  ;;  %v861_v39 = vmin.f32 %v3148_v49, 0.0  ;;  %v2331_v48 = vld [vmem:[#allocation11 + $0xc4] ss:$16 sps:$4 sm:$0xff]   ;;  %v2329_v51 = vld [vmem:[#allocation11 + $0xc0] ss:$16 sps:$4 sm:$0xff]   ;;  %vm858_vm5 = vcmp.gt.f32.partialorder %v3148_v49, 0.0 }
 0x1ec   : > { %v712_v54 = vpack.c.bf16 %v709_v52, %v709_v52  ;;  %v710_v12 = vsel %vm695_vm3, %v650_v55, %v1926_v10  ;;  %v863_v21 = vmul.f32 1.442695, %v860_v20  ;;  %v2337_v20 = vld [vmem:[#allocation13 + $0x10] sm:$0xff]  }
 0x1ed   : > { %v3151_v13 = vpack.c.bf16 %v710_v12, %v710_v12  ;;  %v865_v43 = vmul.f32 1.442695, %v861_v39 }
 0x1ee   : > { %2064 = vmatmul.mubr.bf16.vlgmr.msra.gmra.mrb[12].mxu0 %v712_v54  ;;  %2347 = vpow2.f32 %v863_v21 }
 0x1ef   : > { %1259 = vmatpush1.bf16.msra.mxu0 %v2285_v53  ;;  %1290 = vmatprep.mubr.bf16.mxu0 %v2728_v0  ;;  %2349 = vpow2.f32 %v865_v43  ;;  %v2334_v53 = vld [vmem:[#allocation11 + $0xe4] ss:$16 sps:$4 sm:$0xff]  }
 0x1f0   : > { %1260 = vmatprep.subr.bf16.mxu0 %v2290_v56 }
 0x1f3   : > { %1261 = vmatpush1.bf16.msra.mxu0 %v2288_v57 }
 0x1f4   : > { %1262 = vmatprep.subr.bf16.mxu0 %v2293_v59  ;;  %v2332_v59 = vld [vmem:[#allocation11 + $0xe0] ss:$16 sps:$4 sm:$0xff]  }
 0x1f7   : > { %1263 = vmatpush1.bf16.msra.mxu0 %v2291_v60 }
 0x1f8   : > { %1264 = vmatprep.subr.bf16.mxu0 %v2296_v62  ;;  %v2348_v22 = vpop.eup %2347 }
 0x1f9   : > { %v1936_v25 = vadd.f32 -1.0, %v2348_v22  ;;  %v2350_v50 = vpop.eup %2349  ;;  %v2340_v22 = vld [vmem:[#allocation13 + $0x28] sm:$0xff]  }
 0x1fa   : > { %v1937_v55 = vadd.f32 -1.0, %v2350_v50 }
 0x1fb   : > { %1265 = vmatpush1.bf16.msra.mxu0 %v2294_v63  ;;  %v872_v33 = vsel %vm857_vm4, %v811_v19, %v1936_v25  ;;  %v2336_v19 = vld [vmem:[#allocation13 + $0x8] sm:$0xff]  }
 0x1fc   : > { %1266 = vmatprep.subr.bf16.mxu0 %v2299_v2  ;;  %v875_v35 = vpack.c.bf16 %v872_v33, %v872_v33  ;;  %v873_v60 = vsel %vm858_vm5, %v3148_v49, %v1937_v55 }
 0x1fd   : > { %v876_v61 = vpack.c.bf16 %v873_v60, %v873_v60 }
 0x1ff   : > { %1267 = vmatpush1.bf16.msra.mxu0 %v2297_v3 }
 0x200   : > { %1268 = vmatprep.subr.bf16.mxu0 %v2302_v4 }
 0x203   : > { %1269 = vmatpush1.bf16.msra.mxu0 %v2300_v5 }
 0x204   : > { %1270 = vmatprep.subr.bf16.mxu0 %v2305_v6 }
 0x207   : > { %1271 = vmatpush1.bf16.msra.mxu0 %v2303_v8 }
 0x208   : > { %1272 = vmatprep.subr.bf16.mxu0 %v2308_v9 }
 0x20b   : > { %1273 = vmatpush1.bf16.msra.mxu0 %v2306_v11 }
 0x20c   : > { %2091 = vmatprep.subr.bf16.mxu0 %v2729_v1 }
 0x20e   : > { %1291 = vmatmul.mubr.bf16.vlgmr.msra.gmra.mrb[16].mxu0 %v3151_v13 }
 0x20f   : > { %2093 = vmatprep.mubr.msk.bf16.mxu0 %vm2730_vm0, %v2729_v1 }
 0x2c1   : > { %v976_v23 = vpop.f32.mrb[12].mxu0 }
 0x2c2   : > { %v982_v29 = vpack.c.bf16 %v976_v23, %v976_v23  ;;  %v2065_v30 = vpop.f32.mrb[13].mxu0 }
 0x2c3   : > { %v979_v31 = vpop.f32.mrb[14].mxu0 }
 0x2c4   : > { %v2066_v32 = vpop.f32.mrb[15].mxu0  ;;  %2068 = vmatpush3.bf16.xpose.msra.mxu1 %v982_v29  ;;  %v2342_v29 = vld [vmem:[#allocation13 + $0x38] sm:$0xff]  }
 0x2c5   : > { %1217 = vmatprep.subr.bf16.mxu1 %v2313_v24  ;;  %v2341_v24 = vld [vmem:[#allocation13 + $0x30] sm:$0xff]  }
 0x2cb   : > { %2070 = vmatmul.mubr.bf16.vlgmr.msra.gmra.mrb[4].mxu1 %v875_v35 }
 0x2cc   : > { %1218 = vmatpush1.bf16.msra.mxu1 %v2311_v34  ;;  %1249 = vmatprep.mubr.bf16.mxu1 %v2728_v0  ;;  %v2326_v0 = vld [vmem:[#allocation11 + $0xa0] ss:$16 sps:$4 sm:$0xff]  }
 0x2cd   : > { %1219 = vmatprep.subr.bf16.mxu1 %v2316_v36 }
 0x2d0   : > { %1220 = vmatpush1.bf16.msra.mxu1 %v2314_v27 }
 0x2d1   : > { %1221 = vmatprep.subr.bf16.mxu1 %v2319_v38 }
 0x2d4   : > { %1222 = vmatpush1.bf16.msra.mxu1 %v2317_v40 }
 0x2d5   : > { %1223 = vmatprep.subr.bf16.mxu1 %v2322_v42 }
 0x2d8   : > { %1224 = vmatpush1.bf16.msra.mxu1 %v2320_v44 }
 0x2d9   : > { %1225 = vmatprep.subr.bf16.mxu1 %v2325_v45 }
 0x2dc   : > { %1226 = vmatpush1.bf16.msra.mxu1 %v2323_v46 }
 0x2dd   : > { %1227 = vmatprep.subr.bf16.mxu1 %v2328_v47 }
 0x2e0   : > { %1228 = vmatpush1.bf16.msra.mxu1 %v2326_v0 }
 0x2e1   : > { %v1292_v52 = vpop.f32.mrb[16].mxu0  ;;  %1229 = vmatprep.subr.bf16.mxu1 %v2331_v48 }
 0x2e2   : > { %v1294_v54 = vpop.f32.mrb[17].mxu0  ;;  %v1301_v15 = vpack.c.bf16 %v1292_v52, %v1292_v52 }
 0x2e3   : > { %v1302_v56 = vpack.c.bf16 %v1294_v54, %v1294_v54  ;;  %v1296_v57 = vpop.f32.mrb[18].mxu0 }
 0x2e4   : > { %v1297_v58 = vpop.f32.mrb[19].mxu0  ;;  %1230 = vmatpush1.bf16.msra.mxu1 %v2329_v51 }
 0x2e5   : > { %2092 = vmatpush3.bf16.xpose.msra.mxu0 %v1302_v56  ;;  %1231 = vmatprep.subr.bf16.mxu1 %v2334_v53 }
 0x2e6   : > { %2117 = vmatprep.subr.bf16.mxu0 %v2729_v1 }
 0x2e8   : > { %1232 = vmatpush1.bf16.msra.mxu1 %v2332_v59 }
 0x2e9   : > { %2073 = vmatprep.subr.bf16.mxu1 %v2729_v1 }
 0x2eb   : > { %1250 = vmatmul.mubr.bf16.vlgmr.msra.gmra.mrb[8].mxu1 %v3151_v13  ;;  %v572_v13 = vsub.s32 2, %v3127_v26 }
 0x2ec   : > { %2094 = vmatmul.mubr.bf16.vlgmr.msra.gmra.mrb[20].mxu0 %v876_v61  ;;  %2075 = vmatprep.mubr.msk.bf16.mxu1 %vm2730_vm0, %v2729_v1 }
 0x2ed   : > { %2119 = vmatprep.mubr.msk.bf16.mxu0 %vm2730_vm0, %v2729_v1  ;;  %v573_v16 = vrot.slane %v3133_v28, %v572_v13  ;;  %v2338_v28 = vld [vmem:[#allocation13 + $0x18] sm:$0xff]   ;;  %v737_v44 = vrot.slane %v3143_v41, %v572_v13 }
 0x2ef   : > { %v689_v18 = vadd.f32 %v3138_v37, %v573_v16  ;;  %v2339_v37 = vld [vmem:[#allocation13 + $0x20] sm:$0xff]   ;;  %v852_v45 = vadd.f32 %v3157_v14, %v737_v44 }
 0x2f1   : > { %v699_v26 = vmin.f32 %v689_v18, 0.0  ;;  %vm696_vm7 = vcmp.gt.f32.partialorder %v689_v18, 0.0  ;;  %v862_v46 = vmin.f32 %v852_v45, 0.0  ;;  %vm859_vm8 = vcmp.gt.f32.partialorder %v852_v45, 0.0 }
 0x2f3   : > { %v704_v21 = vmul.f32 1.442695, %v699_v26  ;;  %v867_v47 = vmul.f32 1.442695, %v862_v46 }
 0x2f5   : > { %2351 = vpow2.f32 %v704_v21 }
 0x2f6   : > { %2353 = vpow2.f32 %v867_v47 }
 0x2ff   : > { %v2352_v23 = vpop.eup %2351 }
 0x300   : > { %v1927_v25 = vadd.f32 -1.0, %v2352_v23  ;;  %v2354_v0 = vpop.eup %2353 }
 0x301   : > { %v1938_v50 = vadd.f32 -1.0, %v2354_v0 }
 0x302   : > { %v711_v30 = vsel %vm696_vm7, %v689_v18, %v1927_v25 }
 0x303   : > { %v714_v31 = vpack.c.bf16 %v711_v30, %v711_v30  ;;  %v874_v55 = vsel %vm859_vm8, %v852_v45, %v1938_v50 }
 0x304   : > { %v877_v56 = vpack.c.bf16 %v874_v55, %v874_v55 }
 0x39e   : > { %v1017_v62 = vpop.f32.mrb[4].mxu1 }
 0x39f   : > { %1024 = vst.msk [vmem:[%s535_s8] sm:$0xff] %vm1023_vm6, %v1017_v62  ;;  %v2071_v49 = vpop.f32.mrb[5].mxu1 }
 0x3a0   : > { %v1020_v63 = vpop.f32.mrb[6].mxu1 }
 0x3a1   : > { %v2072_v2 = vpop.f32.mrb[7].mxu1 }
 0x3be   : > { %v1251_v3 = vpop.f32.mrb[8].mxu1 }
 0x3bf   : > { %v1299_v4 = vpack.c.bf16 %v1251_v3, %v1251_v3  ;;  %v1457_v5 = vpop.f32.mrb[20].mxu0  ;;  %v1253_v6 = vpop.f32.mrb[9].mxu1 }
 0x3c0   : > { %1472 = vrot.lane.b32.xlu1 %v1457_v5, %s2731_s4  ;;  %v2095_v7 = vpop.f32.mrb[21].mxu0  ;;  %v1255_v8 = vpop.f32.mrb[10].mxu1  ;;  %v1300_v12 = vpack.c.bf16 %v1253_v6, %v1253_v6  ;;  %s3219_s4 = scalar_lea.hbm %s3379_s30, %s3205_s5 }
 0x3c1   : > { %v1460_v9 = vpop.f32.mrb[22].mxu0  ;;  %v1256_v10 = vpop.f32.mrb[11].mxu1  ;;  %2074 = vmatpush3.bf16.xpose.msra.mxu1 %v1299_v4 }
 0x3c2   : > { %v2096_v11 = vpop.f32.mrb[23].mxu0  ;;  %2079 = vmatprep.subr.bf16.mxu1 %v2729_v1 }
 0x3c8   : > { %2076 = vmatmul.mubr.bf16.vlgmr.msra.gmra.mrb[12].mxu1 %v876_v61 }
 0x3c9   : > { %2080 = vmatpush3.bf16.xpose.msra.mxu1 %v1300_v12  ;;  %2081 = vmatprep.mubr.msk.bf16.mxu1 %vm2730_vm0, %v2729_v1 }
 0x3ca   : > { %2085 = vmatprep.subr.bf16.mxu1 %v2729_v1 }
 0x3d0   : > { %2082 = vmatmul.mubr.bf16.vlgmr.msra.gmra.mrb[16].mxu1 %v876_v61 }
 0x3d1   : > { %2086 = vmatpush3.bf16.xpose.msra.mxu1 %v1301_v15  ;;  %2087 = vmatprep.mubr.msk.bf16.mxu1 %vm2730_vm0, %v2729_v1 }
 0x3d2   : > { %2097 = vmatprep.subr.bf16.mxu1 %v2729_v1 }
 0x3d8   : > { %2088 = vmatmul.mubr.bf16.vlgmr.msra.gmra.mrb[20].mxu1 %v876_v61 }
 0x3d9   : > { %2098 = vmatpush3.bf16.msra.mxu1 %v2335_v17  ;;  %2113 = vmatprep.mubr.msk.bf16.mxu1 %vm2730_vm0, %v2729_v1 }
 0x3da   : > { %2099 = vmatprep.subr.bf16.mxu1 %v2729_v1 }
 0x3dd   : > { %2100 = vmatpush3.bf16.msra.mxu1 %v2336_v19 }
 0x3de   : > { %2101 = vmatprep.subr.bf16.mxu1 %v2729_v1 }
 0x3e1   : > { %2102 = vmatpush3.bf16.msra.mxu1 %v2337_v20 }
 0x3e2   : > { %2103 = vmatprep.subr.bf16.mxu1 %v2729_v1 }
 0x3e5   : > { %2104 = vmatpush3.bf16.msra.mxu1 %v2338_v28 }
 0x3e6   : > { %2105 = vmatprep.subr.bf16.mxu1 %v2729_v1 }
 0x3e9   : > { %2106 = vmatpush3.bf16.msra.mxu1 %v2339_v37 }
 0x3ea   : > { %2107 = vmatprep.subr.bf16.mxu1 %v2729_v1 }
 0x3ed   : > { %2108 = vmatpush3.bf16.msra.mxu1 %v2340_v22 }
 0x3ee   : > { %2109 = vmatprep.subr.bf16.mxu1 %v2729_v1 }
 0x3f1   : > { %2110 = vmatpush3.bf16.msra.mxu1 %v2341_v24 }
 0x3f2   : > { %2111 = vmatprep.subr.bf16.mxu1 %v2729_v1 }
 0x3f5   : > { %2112 = vmatpush3.bf16.msra.mxu1 %v2342_v29 }
 0x3f8   : > { %2114 = vmatmul.mubr.bf16.vlgmr.msra.gmra.mrb[24].mxu1 %v714_v31 }
 0x432   : > { %v1473_v58 = vpop.permute.xlu1 %1472 }
 0x49b   : > { %v1337_v32 = vpop.f32.mrb[12].mxu1 }
 0x49c   : > { %v2077_v33 = vpop.f32.mrb[13].mxu1 }
 0x49d   : > { %v1340_v34 = vpop.f32.mrb[14].mxu1 }
 0x49e   : > { %v2078_v35 = vpop.f32.mrb[15].mxu1 }
 0x4a3   : > { %v1377_v36 = vpop.f32.mrb[16].mxu1 }
 0x4a4   : > { %1464 = vrot.lane.b32.xlu0 %v1377_v36, %s2732_s13  ;;  %v2083_v27 = vpop.f32.mrb[17].mxu1  ;;  %s3223_s13 = scalar_lea.sflag [#allocation16], %s472_s14 }
 0x4a5   : > { %v1380_v38 = vpop.f32.mrb[18].mxu1 }
 0x4a6   : > { %v2084_v39 = vpop.f32.mrb[19].mxu1 }
 0x4ab   : > { %v1417_v40 = vpop.f32.mrb[20].mxu1 }
 0x4ac   : > { %1468 = vrot.lane.b32.xlu0 %v1417_v40, %s2733_s15  ;;  %v2089_v42 = vpop.f32.mrb[21].mxu1  ;;  %s2555_s15 = scalar_lea.vmem %s3213_s7, 128 }
 0x4ad   : > { %v1420_v43 = vpop.f32.mrb[22].mxu1  ;;  %p2556_p13 = scmp.ne.s32.totalorder %s3213_s7, %s2555_s15 }
 0x4ae   : > { %v2090_v1 = vpop.f32.mrb[23].mxu1 }
 0x4af   : > { %p2557_p7 = pnand %p2556_p13, %p3380_p0 }
 0x4b1   : > { %p2558_p5 = pneg %p2557_p7 }
 0x4cb   : > { %v1579_v48 = vpop.f32.mrb[24].mxu1 }
 0x4cc   : > { %v1585_v51 = vpack.c.bf16 %v1579_v48, %v1579_v48  ;;  %v2115_v52 = vpop.f32.mrb[25].mxu1 }
 0x4cd   : > { %v1582_v53 = vpop.f32.mrb[26].mxu1 }
 0x4ce   : > { %v2116_v54 = vpop.f32.mrb[27].mxu1  ;;  %2118 = vmatpush3.bf16.xpose.msra.mxu0 %v1585_v51 }
 0x4d5   : > { %2120 = vmatmul.mubr.bf16.vlgmr.msra.gmra.mrb[24].mxu0 %v877_v56 }
 0x516   : > { %v1465_v41 = vpop.permute.xlu0 %1464 }
 0x517   : > { %v1475_v14 = vsel %vm1023_vm6, %v1337_v32, %v1465_v41 }
 0x51e   : > { %v1469_v57 = vpop.permute.xlu0 %1468 }
 0x51f   : > { %v1477_v59 = vsel %vm1476_vm9, %v1475_v14, %v1469_v57 }
 0x520   : > { %v1479_v60 = vsel %vm1478_vm10, %v1477_v59, %v1473_v58 }
 0x521   : > { %1480 = vst.msk [vmem:[%s542_s6] sm:$0xff] %vm609_vm1, %v1479_v60  ;;  %s2559_s6 = sshll.u32 %s2734_s9, 4  ;;  %s2560_s6 = int_to_ptr.vmem [resolvable:$false] %s2559_s6 }
 0x522   : > { %s2561_s2 = scalar_lea.vmem %s2560_s6, 256  ;;  %p2562_p2 = scmp.lt.s32.totalorder %s3213_s7, %s2560_s6 }
 0x523   : > { %p2563_p4 = scmp.lt.s32.totalorder %s2561_s2, %s2555_s15 }
 0x525   : > { %p2564_p11 = por %p2563_p4, %p2562_p2 }
 0x527   : > { %p2565_p1 = pnand %p2564_p11, %p2558_p5 }
 0x529   : > { %2568 = shalt.err (!%p2565_p1)
}
 0x52a   : > { %s2569_s23 = scalar_lea.hbm %s3211_s29, 128  ;;  %s2573_s16 = scalar_lea.hbm %s3378_s12, 256 }
 0x52b   : > { %p2570_p6 = scmp.ne.s32.totalorder %s3211_s29, %s2569_s23  ;;  %p2574_p8 = scmp.lt.u32.totalorder %s3211_s29, %s3378_s12 }
 0x52c   : > { %p2575_p3 = scmp.lt.u32.totalorder %s2573_s16, %s2569_s23  ;;  %p2577_p13 = scmp.lt.u32.totalorder %s2569_s23, %s3211_s29 }
 0x52d   : > { %p2571_p10 = pnand %p2570_p6, %p3380_p0 }
 0x52e   : > { %p2576_p12 = por %p2575_p3, %p2574_p8 }
 0x52f   : > { %p2572_p9 = pneg %p2571_p10 }
 0x530   : > { %p2578_p7 = por %p2577_p13, %p2576_p12 }
 0x532   : > { %p2579_p5 = pnand %p2578_p7, %p2572_p9 }
 0x534   : > { %2582 = shalt.err (!%p2579_p5)
}
 0x535   : > { %2148 = dma.vmem_to_hbm [thread:$0]  (%p3380_p0), %s3213_s7, 128, %s3211_s29, %s3223_s13  }
 0x536   : > { %s1652_s15 = sshll.u32 %s535_s8, 4  ;;  %s1628_s6 = scalar_lea.sflag [#allocation4], %s3070_s10  ;;  %s1653_s15 = int_to_ptr.vmem [resolvable:$true] %s1652_s15 }
 0x537   : > { %s2583_s2 = scalar_lea.vmem %s1653_s15, 128  ;;  %s2735_s23 = smov [#allocation14]  }
 0x538   : > { %p2584_p2 = scmp.ne.s32.totalorder %s1653_s15, %s2583_s2  ;;  %s2587_s14 = sshll.u32 %s2735_s23, 4  ;;  %s2588_s14 = int_to_ptr.vmem [resolvable:$false] %s2587_s14 }
 0x539   : > { %s2589_s24 = scalar_lea.vmem %s2588_s14, 256  ;;  %p2590_p1 = scmp.lt.s32.totalorder %s1653_s15, %s2588_s14 }
 0x53a   : > { %p2585_p4 = pnand %p2584_p2, %p3380_p0  ;;  %p2591_p6 = scmp.lt.s32.totalorder %s2589_s24, %s2583_s2 }
 0x53c   : > { %p2586_p11 = pneg %p2585_p4  ;;  %p2592_p10 = por %p2591_p6, %p2590_p1 }
 0x53e   : > { %p2593_p9 = pnand %p2592_p10, %p2586_p11 }
 0x540   : > { %2596 = shalt.err (!%p2593_p9)
}
 0x541   : > { %s2597_s10 = scalar_lea.hbm %s3219_s4, 128  ;;  %s2601_s7 = scalar_lea.hbm %s3379_s30, 256 }
 0x542   : > { %p2598_p8 = scmp.ne.s32.totalorder %s3219_s4, %s2597_s10  ;;  %p2602_p13 = scmp.lt.u32.totalorder %s3219_s4, %s3379_s30 }
 0x543   : > { %p2603_p7 = scmp.lt.u32.totalorder %s2601_s7, %s2597_s10  ;;  %p2605_p2 = scmp.lt.u32.totalorder %s2597_s10, %s3219_s4 }
 0x544   : > { %p2599_p3 = pnand %p2598_p8, %p3380_p0 }
 0x545   : > { %p2604_p5 = por %p2603_p7, %p2602_p13 }
 0x546   : > { %p2600_p12 = pneg %p2599_p3 }
 0x547   : > { %p2606_p4 = por %p2605_p2, %p2604_p5 }
 0x549   : > { %p2607_p11 = pnand %p2606_p4, %p2600_p12 }
 0x54b   : > { %2610 = shalt.err (!%p2607_p11)
}
 0x54c   : > { %2147 = dma.vmem_to_hbm [thread:$0]  (%p3380_p0), %s1653_s15, 128, %s3219_s4, %s1628_s6  }
 0x54d   : > { %s549_s9 = scalar_lea.vmem [#allocation17], %s3174_s26  ;;  %s3381_s24 = sld [smem:[#allocation34_spill]] }
 0x54e   : > { %s1680_s2 = sshll.u32 %s549_s9, 4  ;;  %s2736_s26 = smov [#allocation17]   ;;  %s3274_s2 = int_to_ptr.vmem [resolvable:$true] %s1680_s2 }
 0x54f   : > { %s2611_s10 = scalar_lea.vmem %s3274_s2, 128  ;;  %s2615_s4 = sshll.u32 %s2736_s26, 4  ;;  %s2616_s4 = int_to_ptr.vmem [resolvable:$false] %s2615_s4 }
 0x550   : > { %p2612_p1 = scmp.ne.s32.totalorder %s3274_s2, %s2611_s10  ;;  %p2618_p9 = scmp.lt.s32.totalorder %s3274_s2, %s2616_s4 }
 0x552   : > { %p2613_p6 = pnand %p2612_p1, %p3380_p0 }
 0x553   : > { %s3272_s8 = scalar_lea.hbm %s3381_s24, %s3205_s5  ;;  %s2617_s5 = scalar_lea.vmem %s2616_s4, 256 }
 0x554   : > { %p2614_p10 = pneg %p2613_p6  ;;  %p2619_p8 = scmp.lt.s32.totalorder %s2617_s5, %s2611_s10 }
 0x556   : > { %p2620_p3 = por %p2619_p8, %p2618_p9 }
 0x558   : > { %p2621_p12 = pnand %p2620_p3, %p2614_p10 }
 0x5a8   : > { %v1620_v61 = vpop.f32.mrb[24].mxu0 }
 0x5a9   : > { %1626 = vst.msk [vmem:[%s549_s9] sm:$0xff] %vm1023_vm6, %v1620_v61  ;;  %v2121_v62 = vpop.f32.mrb[25].mxu0 }
 0x5aa   : > { %v1623_v49 = vpop.f32.mrb[26].mxu0 }
 0x5ab   : > { %2624 = shalt.err (!%p2621_p12)
}
 0x5ac   : > { %s2625_s15 = scalar_lea.hbm %s3272_s8, 128  ;;  %s2629_s7 = scalar_lea.hbm %s3381_s24, 256 }
 0x5ad   : > { %p2626_p13 = scmp.ne.s32.totalorder %s3272_s8, %s2625_s15  ;;  %p2630_p2 = scmp.lt.u32.totalorder %s3272_s8, %s3381_s24 }
 0x5ae   : > { %p2631_p4 = scmp.lt.u32.totalorder %s2629_s7, %s2625_s15  ;;  %p2633_p1 = scmp.lt.u32.totalorder %s2625_s15, %s3272_s8 }
 0x5af   : > { %p2627_p7 = pnand %p2626_p13, %p3380_p0 }
 0x5b0   : > { %p2632_p11 = por %p2631_p4, %p2630_p2 }
 0x5b1   : > { %p2628_p5 = pneg %p2627_p7 }
 0x5b2   : > { %p2634_p6 = por %p2633_p1, %p2632_p11 }
 0x5b4   : > { %p2635_p10 = pnand %p2634_p6, %p2628_p5 }
 0x5b6   : > { %2638 = shalt.err (!%p2635_p10)
}
 0x5b7   : > { %2149 = dma.vmem_to_hbm [thread:$0]  (%p3380_p0), %s3274_s2, 128, %s3272_s8, %s3223_s13   ;;  %v2122_v63 = vpop.f32.mrb[27].mxu0 }
 0x5b8 PF: > { %s1692_s9 = sand.u32 1, %s2693_s17   ;;  %p3382_p9 = scmp.ne.s32.totalorder %s3366_s28, 0 }
 0x5b9   : > { %p3383_p8 = scmp.ge.s32.totalorder %s2713_s22, 2  ;;  %s1693_s23 = scalar_lea.sflag [#allocation4], %s1692_s9 }
 0x5bb   : > { %p2177_p3 = pnand %p3383_p8, %p3382_p9 }
 0x5bd   : > { %2684 = dma.done.wait (!%p2177_p3), %s1693_s23, 128  }
 0x5be   : > { %2686 = vsyncadd (!%p2177_p3), %s1693_s23, 4294967168  ;;  %s3384_s14 = sadd.s32 4294967294, %s2713_s22  }
 0x5bf   : > { %s1701_s10 = sand.u32 1, %s3384_s14  }
 0x5c0   : > { %s1702_s20 = scalar_lea.sflag [#allocation16], %s1701_s10 }
 0x5c1   : > { %2688 = dma.done.wait (!%p2177_p3), %s1702_s20, 256  }
 0x5c2   : > { %2690 = vsyncadd (!%p2177_p3), %s1702_s20, 4294967040  ;;  %s36_s22 = sadd.s32 1, %s2713_s22   ;;  %s3385_s17 = smov %s2697_s18 }
 0x5c3   : > { %p33_p0 = scmp.ge.s32.totalorder %s36_s22, 4   ;;  %s3386_s18 = smov %s2701_s19 }
 0x5c4   : > { %s3387_s19 = smov %s2990_s25  ;;  %s3388_s20 = smov %s2709_s21 }
 0x5c5   : > { %s3389_s21 = smov %s3391_s27  ;;  %35 = sbr.rel (!%p33_p0) target bundleno = 22 (0x16), region = 166 }
 0x5cc   :  { %1716 = vsyncpa [#allocation3], 1 }
 0x5cd   :  { %1718 = vsyncpa [#allocation3 + $0x1], 1 }
 0x5ce   :  { %1719 = vsyncpa [#allocation6], 1 }
 0x5cf   :  { %1721 = vsyncpa [#allocation6 + $0x1], 1 }
 0x5d0   :  { %1722 = vsyncpa [#allocation9], 1 }
 0x5d1   :  { %1723 = vsyncpa [#allocation12], 1 }
 0x5d2   :  { %1724 = vsyncpa [#allocation4], 1 }
 0x5d3   :  { %1726 = vsyncpa [#allocation4 + $0x1], 1 }
 0x5d4   :  { %1727 = vsyncpa [#allocation16], 1 }
 0x5d5   :  { %1729 = vsyncpa [#allocation16 + $0x1], 1 }

</bundles_post_ra>
